<compile_context>
chip_gen: v5e
topology: v5e:2x2
jax: 0.10.0
libtpu: 0.0.40
codegen_flags: <defaults>
</compile_context>

<pallas_src>
import numpy as np
import jax
import jax.numpy as jnp
from jax.experimental import pallas as pl
from jax.experimental.pallas import tpu as pltpu


# ---------------------------------------------------------------------------
# Deterministic inner-model constants (host-side numpy)
# ---------------------------------------------------------------------------
def _make_gabor_filters(n_filters: int, ksize: int) -> np.ndarray:
    """Deterministic Gabor-like wavelet bank, shape (ksize*ksize, n_filters)."""
    half = (ksize - 1) / 2.0
    yy, xx = np.meshgrid(np.arange(ksize) - half, np.arange(ksize) - half,
                         indexing="ij")
    sigma = ksize / 4.0
    freq = 2.0 * np.pi / (ksize / 2.0)
    filt = np.zeros((ksize * ksize, n_filters), dtype=np.float32)
    for k in range(n_filters):
        theta = np.pi * k / n_filters
        xr = xx * np.cos(theta) + yy * np.sin(theta)
        env = np.exp(-(xx ** 2 + yy ** 2) / (2.0 * sigma ** 2))
        g = env * np.cos(freq * xr)
        g = g - g.mean()                      # zero-mean (wavelet admissibility)
        g = g / (np.linalg.norm(g) + 1e-8)
        filt[:, k] = g.reshape(-1)
    return filt


def _make_band_matrices(filters: np.ndarray, ksize: int, W: int,
                        pad: int) -> np.ndarray:
    """Per-row banded conv matrices on the UNPADDED width.

    T[dy] maps one image row (width W) to all K filter responses at the W
    valid x positions, lane-packed as n = x*K + k.  Horizontal zero-padding
    is implicit: out-of-range taps are simply absent from the band.
    Shape: (ksize, W, W*K).
    """
    K = filters.shape[1]
    w3 = filters.reshape(ksize, ksize, K)          # (dy, dx, k)
    T = np.zeros((ksize, W, W * K), dtype=np.float32)
    for dy in range(ksize):
        for x in range(W):
            for dx in range(ksize):
                xp = x + dx - pad
                if 0 <= xp < W:
                    T[dy, xp, x * K:(x + 1) * K] = w3[dy, dx, :]
    return T


def _make_pool_matrices(B: int, H: int, W: int, K: int, ds: int):
    """Separable, channel-batched average-pool factors (exact in bf16).

    PH : (B*Hp, B*H)       sums groups of `ds` rows (block-diagonal by
                           construction since H % ds == 0).
    PWK: (W*K, (W//ds)*K)  sums groups of `ds` x-positions per filter k and
                           carries the full 1/ds^2 normalization.
    """
    Hp, Wp = H // ds, W // ds
    PH = np.zeros((B * Hp, B * H), dtype=np.float32)
    for q in range(B * H):
        PH[q // ds, q] = 1.0
    PWK = np.zeros((W * K, Wp * K), dtype=np.float32)
    for x in range(W):
        for k in range(K):
            PWK[x * K + k, (x // ds) * K + k] = 1.0 / float(ds * ds)
    return PH, PWK


def _pick_block_channels(nc: int, h: int) -> int:
    """Channels per grid step: target B*H ~ 256 MXU rows (128 suffices on
    v5e), cap at 8 to bound the f32 (B*H, W*K) intermediate / v7x VMEM.
    A single grid step is fine: the grid is a serial loop on one TC."""
    cap = max(1, min(8, 256 // max(h, 1)))
    for b in range(min(nc, cap), 0, -1):
        if nc % b == 0:
            return b
    return 1


# ---------------------------------------------------------------------------
# Fused Pallas kernel: pad/cast + conv (banded MXU matmuls) + |.| + avg pool
# ---------------------------------------------------------------------------
def model_swt_forward(x: jax.Array, filters_np: np.ndarray,
                      ksize: int, ds: int) -> jax.Array:
    """x: (N, C, H, W) f32 -> (N, C*K, H//ds, W//ds) f32."""
    N, C, H, W = x.shape
    KSZ, K = filters_np.shape
    assert KSZ == ksize * ksize and H % ds == 0 and W % ds == 0
    pad = (ksize - 1) // 2
    Hp, Wp = H // ds, W // ds
    NC = N * C
    Hpad = H + 2 * pad
    WK, WpK = W * K, Wp * K
    B = _pick_block_channels(NC, H)
    G = NC // B

    # Constant operands (tiny): banded filters + pooling factors, all bf16
    # (pool entries 1.0 and 1/ds^2 are exactly representable).
    T = jnp.asarray(_make_band_matrices(filters_np, ksize, W, pad),
                    dtype=jnp.bfloat16)
    PH_np, PWK_np = _make_pool_matrices(B, H, W, K, ds)
    PH = jnp.asarray(PH_np, dtype=jnp.bfloat16)
    PWK = jnp.asarray(PWK_np, dtype=jnp.bfloat16)

    # Glue: fold (N, C) -> channel axis (metadata-only reshape).  The kernel
    # reads the raw f32 image directly — no wrapper pad/cast HBM pass.
    x2 = x.reshape(NC, H, W)

    def kernel(x_ref, t_ref, ph_ref, pwk_ref, o_ref, scr_ref):
        # Zero the vertically-padded scratch once; the border rows are never
        # written again (scratch persists across grid steps), the interior is
        # overwritten every step.
        @pl.when(pl.program_id(0) == 0)
        def _init():
            scr_ref[...] = jnp.zeros_like(scr_ref)

        # Fused zero-pad + bf16 cast into VMEM scratch (B, H+2*pad, W).
        scr_ref[:, pl.ds(pad, H), :] = x_ref[...].astype(jnp.bfloat16)

        # Channel-batched correlation: `ksize` banded MXU matmuls with
        # M = B*H rows, bf16 operands, f32 accumulation.  H is a multiple of
        # the bf16 sublane pack (16) so the (B, H, W)->(B*H, W) merge is
        # layout-free.
        acc = jnp.zeros((B * H, WK), jnp.float32)
        for dy in range(ksize):
            lhs = scr_ref[:, pl.ds(dy, H), :].reshape(B * H, W)
            acc = acc + jnp.dot(lhs, t_ref[dy],
                                preferred_element_type=jnp.float32)

        # Modulus + separable ds x ds average pool, batched over channels:
        # two well-shaped bf16 matmuls per grid step.
        s = jnp.abs(acc).astype(jnp.bfloat16)                      # (B*H, W*K)
        pw = jnp.dot(s, pwk_ref[...],
                     preferred_element_type=jnp.float32)           # (B*H, Wp*K)
        pooled = jnp.dot(ph_ref[...], pw.astype(jnp.bfloat16),
                         preferred_element_type=jnp.float32)       # (B*Hp, Wp*K)

        # Single 2-D slab store per grid step (lane-dense for realistic W).
        o_ref[...] = pooled

    out = pl.pallas_call(
        kernel,
        out_shape=jax.ShapeDtypeStruct((NC * Hp, WpK), jnp.float32),
        grid_spec=pltpu.PrefetchScalarGridSpec(
            num_scalar_prefetch=0,
            grid=(G,),
            in_specs=[
                pl.BlockSpec((B, H, W), lambda g: (g, 0, 0)),
                pl.BlockSpec((ksize, W, WK), lambda g: (0, 0, 0)),
                pl.BlockSpec((B * Hp, B * H), lambda g: (0, 0)),
                pl.BlockSpec((WK, WpK), lambda g: (0, 0)),
            ],
            out_specs=pl.BlockSpec((B * Hp, WpK), lambda g: (g, 0)),
            scratch_shapes=[pltpu.VMEM((B, Hpad, W), jnp.bfloat16)],
        ),
        compiler_params=pltpu.CompilerParams(
            dimension_semantics=("parallel",)),
    )(x2, T, PH, PWK)

    # Glue: (NC*Hp, Wp*K) lane-packed (wp, k) -> (N, C*K, Hp, Wp).  Skip this
    # transpose if the consumer accepts the lane-packed layout directly.
    out = out.reshape(N, C, Hp, Wp, K)
    out = jnp.transpose(out, (0, 1, 4, 2, 3)).reshape(N, C * K, Hp, Wp)
    return out


# ---------------------------------------------------------------------------
# Pure-JAX f32 reference of the same computation
# ---------------------------------------------------------------------------
def _reference(x, filters, ksize, ds):
    N, C, H, W = x.shape
    K = filters.shape[1]
    pad = (ksize - 1) // 2
    xp = jnp.pad(x, ((0, 0), (0, 0), (pad, pad), (pad, pad)))
    patches = jnp.stack(
        [xp[:, :, dy:dy + H, dx:dx + W]
         for dy in range(ksize) for dx in range(ksize)], axis=-1)
    s = jnp.abs(jnp.einsum("nchwt,tk->nckhw", patches, filters))
    pooled = s.reshape(N, C, K, H // ds, ds, W // ds, ds).mean(axis=(4, 6))
    return pooled.reshape(N, C * K, H // ds, W // ds)


if __name__ == "__main__":
    N, C, H, W = 2, 4, 16, 16
    KSIZE = 7          # wavelet support
    K_FILT = 8         # number of orientations
    DS = 4             # low-pass / average-pool downsampling

    key = jax.random.PRNGKey(0)
    x = jax.random.normal(key, (N, C, H, W), dtype=jnp.float32)

    filters_np = _make_gabor_filters(K_FILT, KSIZE)            # (49, 8)

    y = jax.block_until_ready(model_swt_forward(x, filters_np, KSIZE, DS))
    y_ref = jax.block_until_ready(
        _reference(x, jnp.asarray(filters_np), KSIZE, DS))

    assert y.shape == (N, C * K_FILT, H // DS, W // DS), y.shape
    # bf16 MXU operands (input, filters, pooling) with f32 accumulation =>
    # slightly looser tolerance than an all-f32 pipeline.
    err = float(np.max(np.abs(np.asarray(y) - np.asarray(y_ref))))
    assert np.allclose(np.asarray(y), np.asarray(y_ref),
                       atol=4e-2, rtol=4e-2), err

    print("KERNEL_OK")
</pallas_src>

<mosaic_0001>
module attributes {stable_mosaic.version = 11 : i64} {
  func.func @kernel(%arg0: i32, %arg1: memref<8x16x16xf32, #tpu.memory_space<vmem>>, %arg2: memref<7x16x128xbf16, #tpu.memory_space<vmem>>, %arg3: memref<32x128xbf16, #tpu.memory_space<vmem>>, %arg4: memref<128x32xbf16, #tpu.memory_space<vmem>>, %arg5: memref<32x32xf32, #tpu.memory_space<vmem>>, %arg6: memref<8x22x16xbf16, #tpu.memory_space<vmem>>) attributes {dimension_semantics = [#tpu.dimension_semantics<parallel>], iteration_bounds = array<i64: 1>, scalar_prefetch = 0 : i64, scratch_operands = 1 : i64, tpu.core_type = #tpu.core_type<tc>, window_params = [{transform_indices = @transform_0, window_bounds = array<i64: 8, 16, 16>}, {pipeline_mode = #tpu.pipeline_mode<synchronous>, transform_indices = @transform_1, window_bounds = array<i64: 7, 16, 128>}, {pipeline_mode = #tpu.pipeline_mode<synchronous>, transform_indices = @transform_2, window_bounds = array<i64: 32, 128>}, {pipeline_mode = #tpu.pipeline_mode<synchronous>, transform_indices = @transform_3, window_bounds = array<i64: 128, 32>}, {transform_indices = @transform_4, window_bounds = array<i64: 32, 32>}]} {
    %c0_i32 = arith.constant 0 : i32
    %0 = arith.cmpi eq, %arg0, %c0_i32 : i32
    %1 = arith.extui %0 : i1 to i32
    %c0_i32_0 = arith.constant 0 : i32
    %2 = arith.cmpi ne, %1, %c0_i32_0 : i32
    scf.if %2 {
      %cst_57 = arith.constant 0.000000e+00 : bf16
      %57 = vector.broadcast %cst_57 : bf16 to vector<8x22x16xbf16>
      %c0_58 = arith.constant 0 : index
      %c0_59 = arith.constant 0 : index
      %c0_60 = arith.constant 0 : index
      %58 = vector.load %arg6[%c0_58, %c0_59, %c0_60] : memref<8x22x16xbf16, #tpu.memory_space<vmem>>, vector<8x22x16xbf16>
      tpu.vector_store %arg6[%c0_58, %c0_59, %c0_60], %57 {strides = array<i32>} : memref<8x22x16xbf16, #tpu.memory_space<vmem>>, vector<8x22x16xbf16>,
    } else {
    }
    %c0 = arith.constant 0 : index
    %c0_1 = arith.constant 0 : index
    %c0_2 = arith.constant 0 : index
    %3 = vector.load %arg1[%c0, %c0_1, %c0_2] : memref<8x16x16xf32, #tpu.memory_space<vmem>>, vector<8x16x16xf32>
    %4 = arith.truncf %3 : vector<8x16x16xf32> to vector<8x16x16xbf16>
    %c0_3 = arith.constant 0 : index
    %c3 = arith.constant 3 : index
    %c0_4 = arith.constant 0 : index
    %5 = vector.load %arg6[%c0_3, %c3, %c0_4] : memref<8x22x16xbf16, #tpu.memory_space<vmem>>, vector<8x16x16xbf16>
    tpu.vector_store %arg6[%c0_3, %c3, %c0_4], %4 {strides = array<i32>} : memref<8x22x16xbf16, #tpu.memory_space<vmem>>, vector<8x16x16xbf16>,
    %cst = arith.constant 0.000000e+00 : f32
    %6 = vector.broadcast %cst : f32 to vector<128x128xf32>
    %c0_5 = arith.constant 0 : index
    %c0_6 = arith.constant 0 : index
    %c0_7 = arith.constant 0 : index
    %7 = vector.load %arg6[%c0_5, %c0_6, %c0_7] : memref<8x22x16xbf16, #tpu.memory_space<vmem>>, vector<8x16x16xbf16>
    %8 = vector.shape_cast %7 : vector<8x16x16xbf16> to vector<128x16xbf16>
    %c0_8 = arith.constant 0 : index
    %c0_9 = arith.constant 0 : index
    %c0_10 = arith.constant 0 : index
    %9 = vector.load %arg2[%c0_8, %c0_9, %c0_10] : memref<7x16x128xbf16, #tpu.memory_space<vmem>>, vector<1x16x128xbf16>
    %10 = vector.shape_cast %9 : vector<1x16x128xbf16> to vector<16x128xbf16>
    %cst_11 = arith.constant dense<0.000000e+00> : vector<128x128xf32>
    %11 = tpu.matmul %8, %10, %cst_11 {dimension_numbers = #tpu.dot_dimension_numbers<[1], [0], [0], [1], [0, 0, 1, 1], [], []>} : vector<128x16xbf16>, vector<16x128xbf16>, vector<128x128xf32> -> vector<128x128xf32>
    %12 = arith.addf %6, %11 : vector<128x128xf32>
    %c0_12 = arith.constant 0 : index
    %c1 = arith.constant 1 : index
    %c0_13 = arith.constant 0 : index
    %13 = vector.load %arg6[%c0_12, %c1, %c0_13] : memref<8x22x16xbf16, #tpu.memory_space<vmem>>, vector<8x16x16xbf16>
    %14 = vector.shape_cast %13 : vector<8x16x16xbf16> to vector<128x16xbf16>
    %c1_14 = arith.constant 1 : index
    %c0_15 = arith.constant 0 : index
    %c0_16 = arith.constant 0 : index
    %15 = vector.load %arg2[%c1_14, %c0_15, %c0_16] : memref<7x16x128xbf16, #tpu.memory_space<vmem>>, vector<1x16x128xbf16>
    %16 = vector.shape_cast %15 : vector<1x16x128xbf16> to vector<16x128xbf16>
    %cst_17 = arith.constant dense<0.000000e+00> : vector<128x128xf32>
    %17 = tpu.matmul %14, %16, %cst_17 {dimension_numbers = #tpu.dot_dimension_numbers<[1], [0], [0], [1], [0, 0, 1, 1], [], []>} : vector<128x16xbf16>, vector<16x128xbf16>, vector<128x128xf32> -> vector<128x128xf32>
    %18 = arith.addf %12, %17 : vector<128x128xf32>
    %c0_18 = arith.constant 0 : index
    %c2 = arith.constant 2 : index
    %c0_19 = arith.constant 0 : index
    %19 = vector.load %arg6[%c0_18, %c2, %c0_19] : memref<8x22x16xbf16, #tpu.memory_space<vmem>>, vector<8x16x16xbf16>
    %20 = vector.shape_cast %19 : vector<8x16x16xbf16> to vector<128x16xbf16>
    %c2_20 = arith.constant 2 : index
    %c0_21 = arith.constant 0 : index
    %c0_22 = arith.constant 0 : index
    %21 = vector.load %arg2[%c2_20, %c0_21, %c0_22] : memref<7x16x128xbf16, #tpu.memory_space<vmem>>, vector<1x16x128xbf16>
    %22 = vector.shape_cast %21 : vector<1x16x128xbf16> to vector<16x128xbf16>
    %cst_23 = arith.constant dense<0.000000e+00> : vector<128x128xf32>
    %23 = tpu.matmul %20, %22, %cst_23 {dimension_numbers = #tpu.dot_dimension_numbers<[1], [0], [0], [1], [0, 0, 1, 1], [], []>} : vector<128x16xbf16>, vector<16x128xbf16>, vector<128x128xf32> -> vector<128x128xf32>
    %24 = arith.addf %18, %23 : vector<128x128xf32>
    %c0_24 = arith.constant 0 : index
    %c3_25 = arith.constant 3 : index
    %c0_26 = arith.constant 0 : index
    %25 = vector.load %arg6[%c0_24, %c3_25, %c0_26] : memref<8x22x16xbf16, #tpu.memory_space<vmem>>, vector<8x16x16xbf16>
    %26 = vector.shape_cast %25 : vector<8x16x16xbf16> to vector<128x16xbf16>
    %c3_27 = arith.constant 3 : index
    %c0_28 = arith.constant 0 : index
    %c0_29 = arith.constant 0 : index
    %27 = vector.load %arg2[%c3_27, %c0_28, %c0_29] : memref<7x16x128xbf16, #tpu.memory_space<vmem>>, vector<1x16x128xbf16>
    %28 = vector.shape_cast %27 : vector<1x16x128xbf16> to vector<16x128xbf16>
    %cst_30 = arith.constant dense<0.000000e+00> : vector<128x128xf32>
    %29 = tpu.matmul %26, %28, %cst_30 {dimension_numbers = #tpu.dot_dimension_numbers<[1], [0], [0], [1], [0, 0, 1, 1], [], []>} : vector<128x16xbf16>, vector<16x128xbf16>, vector<128x128xf32> -> vector<128x128xf32>
    %30 = arith.addf %24, %29 : vector<128x128xf32>
    %c0_31 = arith.constant 0 : index
    %c4 = arith.constant 4 : index
    %c0_32 = arith.constant 0 : index
    %31 = vector.load %arg6[%c0_31, %c4, %c0_32] : memref<8x22x16xbf16, #tpu.memory_space<vmem>>, vector<8x16x16xbf16>
    %32 = vector.shape_cast %31 : vector<8x16x16xbf16> to vector<128x16xbf16>
    %c4_33 = arith.constant 4 : index
    %c0_34 = arith.constant 0 : index
    %c0_35 = arith.constant 0 : index
    %33 = vector.load %arg2[%c4_33, %c0_34, %c0_35] : memref<7x16x128xbf16, #tpu.memory_space<vmem>>, vector<1x16x128xbf16>
    %34 = vector.shape_cast %33 : vector<1x16x128xbf16> to vector<16x128xbf16>
    %cst_36 = arith.constant dense<0.000000e+00> : vector<128x128xf32>
    %35 = tpu.matmul %32, %34, %cst_36 {dimension_numbers = #tpu.dot_dimension_numbers<[1], [0], [0], [1], [0, 0, 1, 1], [], []>} : vector<128x16xbf16>, vector<16x128xbf16>, vector<128x128xf32> -> vector<128x128xf32>
    %36 = arith.addf %30, %35 : vector<128x128xf32>
    %c0_37 = arith.constant 0 : index
    %c5 = arith.constant 5 : index
    %c0_38 = arith.constant 0 : index
    %37 = vector.load %arg6[%c0_37, %c5, %c0_38] : memref<8x22x16xbf16, #tpu.memory_space<vmem>>, vector<8x16x16xbf16>
    %38 = vector.shape_cast %37 : vector<8x16x16xbf16> to vector<128x16xbf16>
    %c5_39 = arith.constant 5 : index
    %c0_40 = arith.constant 0 : index
    %c0_41 = arith.constant 0 : index
    %39 = vector.load %arg2[%c5_39, %c0_40, %c0_41] : memref<7x16x128xbf16, #tpu.memory_space<vmem>>, vector<1x16x128xbf16>
    %40 = vector.shape_cast %39 : vector<1x16x128xbf16> to vector<16x128xbf16>
    %cst_42 = arith.constant dense<0.000000e+00> : vector<128x128xf32>
    %41 = tpu.matmul %38, %40, %cst_42 {dimension_numbers = #tpu.dot_dimension_numbers<[1], [0], [0], [1], [0, 0, 1, 1], [], []>} : vector<128x16xbf16>, vector<16x128xbf16>, vector<128x128xf32> -> vector<128x128xf32>
    %42 = arith.addf %36, %41 : vector<128x128xf32>
    %c0_43 = arith.constant 0 : index
    %c6 = arith.constant 6 : index
    %c0_44 = arith.constant 0 : index
    %43 = vector.load %arg6[%c0_43, %c6, %c0_44] : memref<8x22x16xbf16, #tpu.memory_space<vmem>>, vector<8x16x16xbf16>
    %44 = vector.shape_cast %43 : vector<8x16x16xbf16> to vector<128x16xbf16>
    %c6_45 = arith.constant 6 : index
    %c0_46 = arith.constant 0 : index
    %c0_47 = arith.constant 0 : index
    %45 = vector.load %arg2[%c6_45, %c0_46, %c0_47] : memref<7x16x128xbf16, #tpu.memory_space<vmem>>, vector<1x16x128xbf16>
    %46 = vector.shape_cast %45 : vector<1x16x128xbf16> to vector<16x128xbf16>
    %cst_48 = arith.constant dense<0.000000e+00> : vector<128x128xf32>
    %47 = tpu.matmul %44, %46, %cst_48 {dimension_numbers = #tpu.dot_dimension_numbers<[1], [0], [0], [1], [0, 0, 1, 1], [], []>} : vector<128x16xbf16>, vector<16x128xbf16>, vector<128x128xf32> -> vector<128x128xf32>
    %48 = arith.addf %42, %47 : vector<128x128xf32>
    %49 = math.absf %48 : vector<128x128xf32>
    %50 = arith.truncf %49 : vector<128x128xf32> to vector<128x128xbf16>
    %c0_49 = arith.constant 0 : index
    %c0_50 = arith.constant 0 : index
    %51 = vector.load %arg4[%c0_49, %c0_50] : memref<128x32xbf16, #tpu.memory_space<vmem>>, vector<128x32xbf16>
    %cst_51 = arith.constant dense<0.000000e+00> : vector<128x32xf32>
    %52 = tpu.matmul %50, %51, %cst_51 {dimension_numbers = #tpu.dot_dimension_numbers<[1], [0], [0], [1], [0, 0, 1, 1], [], []>} : vector<128x128xbf16>, vector<128x32xbf16>, vector<128x32xf32> -> vector<128x32xf32>
    %c0_52 = arith.constant 0 : index
    %c0_53 = arith.constant 0 : index
    %53 = vector.load %arg3[%c0_52, %c0_53] : memref<32x128xbf16, #tpu.memory_space<vmem>>, vector<32x128xbf16>
    %54 = arith.truncf %52 : vector<128x32xf32> to vector<128x32xbf16>
    %cst_54 = arith.constant dense<0.000000e+00> : vector<32x32xf32>
    %55 = tpu.matmul %53, %54, %cst_54 {dimension_numbers = #tpu.dot_dimension_numbers<[1], [0], [0], [1], [0, 0, 1, 1], [], []>} : vector<32x128xbf16>, vector<128x32xbf16>, vector<32x32xf32> -> vector<32x32xf32>
    %c0_55 = arith.constant 0 : index
    %c0_56 = arith.constant 0 : index
    %56 = vector.load %arg5[%c0_55, %c0_56] : memref<32x32xf32, #tpu.memory_space<vmem>>, vector<32x32xf32>
    tpu.vector_store %arg5[%c0_55, %c0_56], %55 {strides = array<i32>} : memref<32x32xf32, #tpu.memory_space<vmem>>, vector<32x32xf32>,
    return
  }
  func.func @transform_0(%arg0: i32) -> (i32, i32, i32) {
    %c0_i32 = arith.constant 0 : i32
    %c0_i32_0 = arith.constant 0 : i32
    %c0_i32_1 = arith.constant 0 : i32
    return %arg0, %c0_i32, %c0_i32_0 : i32, i32, i32
  }
  func.func @transform_1(%arg0: i32) -> (i32, i32, i32) {
    %c0_i32 = arith.constant 0 : i32
    %c0_i32_0 = arith.constant 0 : i32
    %c0_i32_1 = arith.constant 0 : i32
    %c0_i32_2 = arith.constant 0 : i32
    return %c0_i32, %c0_i32_0, %c0_i32_1 : i32, i32, i32
  }
  func.func @transform_2(%arg0: i32) -> (i32, i32) {
    %c0_i32 = arith.constant 0 : i32
    %c0_i32_0 = arith.constant 0 : i32
    %c0_i32_1 = arith.constant 0 : i32
    return %c0_i32, %c0_i32_0 : i32, i32
  }
  func.func @transform_3(%arg0: i32) -> (i32, i32) {
    %c0_i32 = arith.constant 0 : i32
    %c0_i32_0 = arith.constant 0 : i32
    %c0_i32_1 = arith.constant 0 : i32
    return %c0_i32, %c0_i32_0 : i32, i32
  }
  func.func @transform_4(%arg0: i32) -> (i32, i32) {
    %c0_i32 = arith.constant 0 : i32
    %c0_i32_0 = arith.constant 0 : i32
    return %arg0, %c0_i32 : i32, i32
  }
}

</mosaic_0001>

<bundles_post_ra>
// kernel: tpu_custom_call.1
= control target key start
LH: loop header
LB: loop body
LE: loop exit
PB: predicated region body
PF: predicated region fallthrough
CT: control target
= control target key end

     0   :  { %9 = vsyncpa [#allocation4], 0  ;;  %s3357_s0 = inlined_call_operand.hbm [shape: f32[8,16,16], index: 0, kind: input, shape index: {}]   ;;  %s3358_s1 = inlined_call_operand.vmem [shape: bf16[7,16,128], index: 1, kind: input, shape index: {}]   ;;  %s3359_s2 = inlined_call_operand.vmem [shape: bf16[32,128], index: 2, kind: input, shape index: {}]   ;;  %s3360_s3 = inlined_call_operand.vmem [shape: bf16[128,32], index: 3, kind: input, shape index: {}]   ;;  %s3361_s4 = inlined_call_operand.hbm [shape: f32[32,32], index: 4, kind: output, shape index: {}]  }
   0x1   :  { %10 = vsyncpa [#allocation5], 0  ;;  %s15_s17 = sshll.u32 %s3357_s0, 4  ;;  %s2514_s18 = smov [#allocation3]   ;;  %s16_s17 = int_to_ptr.hbm [resolvable:$true] %s15_s17 }
   0x2   :  { %s17_s19 = sshll.u32 %s2514_s18, 4  ;;  %s2515_s20 = smov 128   ;;  %s18_s19 = int_to_ptr.vmem [resolvable:$true] %s17_s19 }
   0x3   :  { %s2516_s21 = smov 8  }
   0x4   :  { %23 = dma.hbm_to_vmem [thread:$0]  %s16_s17, 2048, %s18_s19, [#allocation4], %s2515_s20, %s2515_s20, %s2516_s21  }
   0x5   :  { %2510 = dma.done.wait [#allocation4], 2048  }
   0x6   :  { %2511 = vsyncadd [#allocation4], 4294965248  ;;  %vm39_vm0 = vcmask 125952   ;;  %vm42_vm1 = vcmask 124928   ;;  %v2517_v0 = vmov 0   ;;  %v2436_v1 = vld [vmem:[%s3358_s1 + $0x8] sm:$0xff] }
   0x7   :  { %40 = vst.msk [vmem:[#allocation2] sm:$0xf] %vm39_vm0, %v2517_v0  ;;  %vm97_vm2 = vsmask.f32 1280  ;;  %v65_v2 = vld [vmem:[#allocation3] sm:$0xff]  ;;  %v66_v3 = vld [vmem:[#allocation3 + $0x8] sm:$0xff]  ;;  %624 = vmatpush.bf16.msra.mxu0 %v2436_v1  ;;  %2452 = vmatpush.bf16.msra.mxu1 %v2436_v1 }
   0x8   :  { %41 = vst.msk [vmem:[#allocation2 + $0x4] sm:$0xf] %vm39_vm0, %v2517_v0  ;;  %vm276_vm3 = vcmask 125953   ;;  %v81_v4 = vpack.c.bf16 %v65_v2, %v65_v2  ;;  %v82_v5 = vpack.c.bf16 %v66_v3, %v66_v3  ;;  %vm98_vm4 = vsmask.f32 5392  ;;  %v79_v6 = vld [vmem:[#allocation3 + $0x70] sm:$0xff] }
   0x9   :  { %43 = vst.msk [vmem:[#allocation2 + $0x8] sm:$0x7] %vm42_vm1, %v2517_v0  ;;  %v80_v7 = vld [vmem:[#allocation3 + $0x78] sm:$0xff]  ;;  %vm277_vm5 = vsmask.f32 7942  ;;  %vm284_vm6 = vcmask 123904   ;;  %v95_v8 = vpack.c.bf16 %v79_v6, %v79_v6  ;;  %vm2585_vm8 = vmor %vm97_vm2, %vm98_vm4 }
   0xa   :  { %44 = vst.msk [vmem:[#allocation2 + $0xc] sm:$0xf] %vm39_vm0, %v2517_v0  ;;  %v96_v9 = vpack.c.bf16 %v80_v7, %v80_v7  ;;  %v101_v10 = vshrl.u32 %v81_v4, 16  ;;  %v104_v11 = vshll.u32 %v81_v4, 16  ;;  %v110_v12 = vshrl.u32 %v82_v5, 16  ;;  %v67_v14 = vld [vmem:[#allocation3 + $0x10] sm:$0xff]  ;;  %vm2577_vm7 = vmand %vm276_vm3, %vm277_vm5 }
   0xb   :  { %45 = vst.msk [vmem:[#allocation2 + $0x10] sm:$0xf] %vm39_vm0, %v2517_v0  ;;  %v113_v13 = vshll.u32 %v82_v5, 16  ;;  %v68_v15 = vld [vmem:[#allocation3 + $0x18] sm:$0xff]  ;;  %v234_v16 = vshrl.u32 %v95_v8, 16  ;;  %v237_v17 = vshll.u32 %v95_v8, 16  ;;  %v83_v31 = vpack.c.bf16 %v67_v14, %v67_v14  ;;  %vm2593_vm9 = vmand %vm284_vm6, %vm97_vm2 }
   0xc   :  { %46 = vst.msk [vmem:[#allocation2 + $0x14] sm:$0x7] %vm42_vm1, %v2517_v0  ;;  %v243_v18 = vshrl.u32 %v96_v9, 16  ;;  %v246_v19 = vshll.u32 %v96_v9, 16  ;;  %v103_v20 = vrot.slane %v101_v10, 6  ;;  %v106_v21 = vrot.slane %v104_v11, 7 }
   0xd   :  { %47 = vst.msk [vmem:[#allocation2 + $0x18] sm:$0xf] %vm39_vm0, %v2517_v0  ;;  %v112_v22 = vrot.slane %v110_v12, 6  ;;  %v115_v23 = vrot.slane %v113_v13, 7  ;;  %v236_v26 = vrot.slane %v234_v16, 6  ;;  %v239_v27 = vrot.slane %v237_v17, 7 }
   0xe   :  { %48 = vst.msk [vmem:[#allocation2 + $0x1c] sm:$0xf] %vm39_vm0, %v2517_v0  ;;  %v279_v25 = vld [vmem:[#allocation2] sm:$0xe]  ;;  %v107_v29 = vor.u32 %v106_v21, %v103_v20  ;;  %v84_v32 = vpack.c.bf16 %v68_v15, %v68_v15  ;;  %v245_v35 = vrot.slane %v243_v18, 6  ;;  %v248_v36 = vrot.slane %v246_v19, 7 }
   0xf   :  { %49 = vst.msk [vmem:[#allocation2 + $0x20] sm:$0x7] %vm42_vm1, %v2517_v0  ;;  %v116_v30 = vor.u32 %v115_v23, %v112_v22  ;;  %v120_v40 = vshrl.u32 %v83_v31, 16  ;;  %v2603_v41 = vor.u32 %v239_v27, %v236_v26  ;;  %v123_v42 = vshll.u32 %v83_v31, 16  ;;  %v2437_v56 = vld [vmem:[%s3358_s1 + $0x10] sm:$0xff]  ;;  %v2438_v1 = vld [vmem:[%s3358_s1 + $0x18] sm:$0xff] }
  0x10   :  { %50 = vst.msk [vmem:[#allocation2 + $0x24] sm:$0xf] %vm39_vm0, %v2517_v0  ;;  %v286_v34 = vld [vmem:[#allocation2 + $0x8] sm:$0x3]  ;;  %v108_v37 = vrot.slane %v107_v29, 4  ;;  %v280_v39 = vsel %vm2577_vm7, %v107_v29, %v279_v25  ;;  %v129_v43 = vshrl.u32 %v84_v32, 16  ;;  %v2612_v49 = vor.u32 %v248_v36, %v245_v35  ;;  %932 = vmatpush.bf16.msra.mxu2 %v2437_v56  ;;  %1249 = vmatpush.bf16.msra.mxu3 %v2438_v1 }
  0x11   :  { %51 = vst.msk [vmem:[#allocation2 + $0x28] sm:$0xf] %vm39_vm0, %v2517_v0  ;;  %v118_v38 = vrot.slane %v116_v30, 4  ;;  %v122_v46 = vrot.slane %v120_v40, 6  ;;  %v132_v47 = vshll.u32 %v84_v32, 16  ;;  %v125_v48 = vrot.slane %v123_v42, 7 }
  0x12   :  { %52 = vst.msk [vmem:[#allocation2 + $0x2c] sm:$0x7] %vm42_vm1, %v2517_v0  ;;  %v117_v44 = vsel %vm2585_vm8, %v108_v37, %v116_v30  ;;  %v131_v50 = vrot.slane %v129_v43, 6  ;;  %vm364_vm10 = vsmask.f32 3328  ;;  %v241_v53 = vrot.slane %v2603_v41, 4 }
  0x13   :  { %53 = vst.msk [vmem:[#allocation2 + $0x30] sm:$0xf] %vm39_vm0, %v2517_v0  ;;  %v287_v45 = vsel %vm2593_vm9, %v118_v38, %v286_v34  ;;  %v134_v51 = vrot.slane %v132_v47, 7  ;;  %vm365_vm11 = vsmask.f32 7440  ;;  %v126_v52 = vor.u32 %v125_v48, %v122_v46  ;;  %v2435_v4 = vld [vmem:[%s3358_s1] sm:$0xff] }
  0x14   :  { %54 = vst.msk [vmem:[#allocation2 + $0x34] sm:$0xf] %vm39_vm0, %v2517_v0  ;;  %v251_v54 = vrot.slane %v2612_v49, 4  ;;  %v289_v55 = vld [vmem:[#allocation2 + $0xc] sm:$0xe]  ;;  %vm809_vm12 = vcmask 1042432   ;;  %v250_v3 = vsel %vm2585_vm8, %v241_v53, %v2612_v49  ;;  %743 = vmatpush.bf16.msrb.mxu1 %v2435_v4  ;;  %vm2665_vm2 = vmor %vm364_vm10, %vm365_vm11 }
  0x15   :  { %55 = vst.msk [vmem:[#allocation2 + $0x38] sm:$0x7] %vm42_vm1, %v2517_v0  ;;  %vm810_vm13 = vcmask 1046532   ;;  %v127_v57 = vrot.slane %v126_v52, 4  ;;  %v2627_v60 = vor.u32 %v134_v51, %v131_v50  ;;  %v290_v6 = vsel %vm2577_vm7, %v126_v52, %v289_v55  ;;  %v293_v48 = vld [vmem:[#allocation2 + $0x14] sm:$0x3] }
  0x16   :  { %281 = vst [vmem:[#allocation2] sm:$0xe] %v280_v39  ;;  %vm2650_vm14 = vmor %vm809_vm12, %vm810_vm13  ;;  %vm592_vm15 = vcmask 130048   ;;  %vm998_vm3 = vsmask.f32 2304  ;;  %v69_v56 = vld [vmem:[#allocation3 + $0x20] sm:$0xff] }
  0x17   :  { %56 = vst.msk [vmem:[#allocation2 + $0x3c] sm:$0xf] %vm39_vm0, %v2517_v0  ;;  %v136_v16 = vsel %vm2585_vm8, %v127_v57, %v2627_v60  ;;  %v137_v55 = vrot.slane %v2627_v60, 4  ;;  %v70_v57 = vld [vmem:[#allocation3 + $0x28] sm:$0xff]  ;;  %v2439_v33 = vld [vmem:[%s3358_s1 + $0x20] sm:$0xff]  ;;  %vm1332_vm5 = vcmask 1045508  }
  0x18   :  { %283 = vst.msk [vmem:[#allocation2 + $0x4] sm:$0xf] %vm39_vm0, %v117_v44  ;;  %1454 = vmatpush.bf16.msrb.mxu0 %v2439_v33  ;;  %s2518_s28 = smov [#allocation6]   ;;  %s2222_s6 = sshll.u32 %s3361_s4, 4  ;;  %s2223_s6 = int_to_ptr.hbm [resolvable:$true] %s2222_s6 }
  0x19   :  { %288 = vst [vmem:[#allocation2 + $0x8] sm:$0x3] %v287_v45  ;;  %s2220_s29 = sshll.u32 %s2518_s28, 4  ;;  %s2221_s29 = int_to_ptr.vmem [resolvable:$true] %s2220_s29 }
  0x1a   :  { %57 = vst.msk [vmem:[#allocation2 + $0x40] sm:$0xf] %vm39_vm0, %v2517_v0 }
  0x1b   :  { %58 = vst.msk [vmem:[#allocation2 + $0x44] sm:$0x7] %vm42_vm1, %v2517_v0 }
  0x1c   :  { %59 = vst.msk [vmem:[#allocation2 + $0x48] sm:$0xf] %vm39_vm0, %v2517_v0 }
  0x1d   :  { %v338_v58 = vld [vmem:[#allocation2] sm:$0xf]  ;;  %60 = vst.msk [vmem:[#allocation2 + $0x4c] sm:$0xf] %vm39_vm0, %v2517_v0 }
  0x1e   :  { %v785_v59 = vld [vmem:[#allocation2] sm:$0xe]  ;;  %v368_v61 = vshrl.u32 %v338_v58, 16  ;;  %v371_v62 = vshll.u32 %v338_v58, 16  ;;  %61 = vst.msk [vmem:[#allocation2 + $0x50] sm:$0x7] %vm42_vm1, %v2517_v0 }
  0x1f   :  { %v2293_v63 = vrot.slane %v785_v59, 9  ;;  %v339_v2 = vld [vmem:[#allocation2 + $0x4] sm:$0xf]  ;;  %62 = vst.msk [vmem:[#allocation2 + $0x54] sm:$0xf] %vm39_vm0, %v2517_v0  ;;  %v1002_v5 = vshrl.u32 %v785_v59, 16 }
  0x20   :  { %v356_v7 = vld [vmem:[#allocation2 + $0x8] sm:$0x1]  ;;  %v370_v8 = vrot.slane %v368_v61, 4  ;;  %v373_v9 = vrot.slane %v371_v62, 5  ;;  %v2644_v10 = vshll.u32 %v339_v2, 16  ;;  %v2646_v11 = vshrl.u32 %v339_v2, 16 }
  0x21   :  { %v387_v13 = vshll.u32 %v356_v7, 16  ;;  %63 = vst.msk [vmem:[#allocation2 + $0x58] sm:$0xf] %vm39_vm0, %v2517_v0  ;;  %v814_v14 = vrot.slane %v339_v2, 5  ;;  %v817_v15 = vrot.slane %v356_v7, 5  ;;  %v1004_v20 = vrot.slane %v1002_v5, 5 }
  0x22   :  { %v374_v17 = vor.u32 %v373_v9, %v370_v8  ;;  %v379_v18 = vrot.slane %v2644_v10, 5  ;;  %v383_v19 = vrot.slane %v2646_v11, 4  ;;  %64 = vst.msk [vmem:[#allocation2 + $0x5c] sm:$0x7] %vm42_vm1, %v2517_v0  ;;  %v990_v26 = vld [vmem:[#allocation2 + $0x8] sm:$0x3]  ;;  %v2702_v5 = vpack.c.bf16 %v69_v56, %v69_v56 }
  0x23   :  { %v389_v22 = vrot.slane %v387_v13, 5  ;;  %334 = vst.msk [vmem:[#allocation2 + $0x58] sm:$0xf] %vm39_vm0, %v250_v3  ;;  %v815_v23 = vsel %vm2650_vm14, %v2293_v63, %v814_v14  ;;  %v816_v25 = vrot.slane %v814_v14, 4  ;;  %vm999_vm1 = vsmask.f32 6416 }
  0x24   :  { %v375_v27 = vrot.slane %v374_v17, 4  ;;  %v384_v29 = vor.u32 %v383_v19, %v379_v18  ;;  %v871_v30 = vunpack.c.l.b16 %v815_v23  ;;  %291 = vst [vmem:[#allocation2 + $0xc] sm:$0xe] %v290_v6  ;;  %v1005_v31 = vshll.u32 %v785_v59, 16  ;;  %vm2692_vm4 = vmor %vm998_vm3, %vm999_vm1 }
  0x25   :  { %v818_v0 = vsel %vm2650_vm14, %v816_v25, %v817_v15  ;;  %v1010_v32 = vrot.slane %v2646_v11, 5  ;;  %292 = vst.msk [vmem:[#allocation2 + $0x10] sm:$0xf] %vm39_vm0, %v136_v16  ;;  %v1011_v38 = vrot.slane %v2644_v10, 6  ;;  %v1016_v43 = vshrl.u32 %v990_v26, 16 }
  0x26   :  { %v380_v34 = vsel %vm2665_vm2, %v375_v27, %v379_v18  ;;  %v385_v35 = vrot.slane %v384_v29, 4  ;;  %v331_v36 = vld [vmem:[#allocation2 + $0x54] sm:$0xe]  ;;  %v872_v37 = vunpack.c.l.b16 %v818_v0  ;;  %v1007_v42 = vrot.slane %v1005_v31, 6 }
  0x27   :  { %v562_v39 = vunpack.c.l.b16 %v380_v34  ;;  %v332_v40 = vsel %vm2577_vm7, %v2603_v41, %v331_v36  ;;  %v1012_v46 = vor.u32 %v1011_v38, %v1010_v32  ;;  %v1019_v47 = vshll.u32 %v990_v26, 16 }
  0x28   :  { %v390_v44 = vsel %vm2665_vm2, %v385_v35, %v389_v22  ;;  %333 = vst [vmem:[#allocation2 + $0x54] sm:$0xe] %v332_v40  ;;  %v887_v45 = vpack.c.b16 %v872_v37, %v871_v30  ;;  %v1008_v52 = vor.u32 %v1007_v42, %v1004_v20  ;;  %v1018_v53 = vrot.slane %v1016_v43, 5 }
  0x29   :  { %v563_v50 = vunpack.c.l.b16 %v390_v44  ;;  %v335_v51 = vld [vmem:[#allocation2 + $0x5c] sm:$0x3]  ;;  %v1014_v61 = vrot.slane %v1012_v46, 4  ;;  %v1021_v62 = vrot.slane %v1019_v47, 6  ;;  %v2704_v6 = vpack.c.bf16 %v70_v57, %v70_v57 }
  0x2a   :  { %v336_v41 = vsel %vm2593_vm9, %v251_v54, %v335_v51  ;;  %v353_v58 = vld [vmem:[#allocation2 + $0x58] sm:$0xf]  ;;  %2307 = vmatmul.msk.bf16.vlgmr.msra.gmra.mxu2 %vm592_vm15, %v887_v45  ;;  %v1009_v49 = vrot.slane %v1008_v52, 4  ;;  %v294_v54 = vsel %vm2593_vm9, %v137_v55, %v293_v48 }
  0x2b   :  { %v578_v63 = vpack.c.b16 %v563_v50, %v562_v39  ;;  %337 = vst [vmem:[#allocation2 + $0x5c] sm:$0x3] %v336_v41  ;;  %v2696_v60 = vshll.u32 %v353_v58, 16  ;;  %v2698_v1 = vshrl.u32 %v353_v58, 16  ;;  %v1022_v2 = vor.u32 %v1021_v62, %v1018_v53  ;;  %v340_v3 = vld [vmem:[#allocation2 + $0xc] sm:$0xf] }
  0x2c   :  { %v341_v4 = vld [vmem:[#allocation2 + $0x10] sm:$0xf]  ;;  %v1013_v9 = vsel %vm2692_vm4, %v1009_v49, %v1012_v46  ;;  %295 = vst [vmem:[#allocation2 + $0x14] sm:$0x3] %v294_v54  ;;  %v392_v13 = vshrl.u32 %v340_v3, 16  ;;  %v395_v16 = vshll.u32 %v340_v3, 16 }
  0x2d   :  { %2241 = vmatmul.msk.bf16.vlgmr.msra.gmra.mxu0 %vm592_vm15, %v578_v63  ;;  %v547_v7 = vrot.slane %v2696_v60, 5  ;;  %v551_v8 = vrot.slane %v2698_v1, 4  ;;  %v1023_v14 = vsel %vm2692_vm4, %v1014_v61, %v1022_v2  ;;  %v1188_v15 = vunpack.c.l.b16 %v1013_v9  ;;  %v786_v18 = vld [vmem:[#allocation2 + $0xc] sm:$0xe] }
  0x2e   :  { %v2713_v17 = vshll.u32 %v341_v4, 16  ;;  %v1189_v22 = vunpack.c.l.b16 %v1023_v14  ;;  %v394_v23 = vrot.slane %v392_v13, 4  ;;  %v2715_v25 = vshrl.u32 %v341_v4, 16 }
  0x2f   :  { %v352_v19 = vld [vmem:[#allocation2 + $0x54] sm:$0xf]  ;;  %v552_v20 = vor.u32 %v551_v8, %v547_v7  ;;  %v397_v29 = vrot.slane %v395_v16, 5  ;;  %v2294_v34 = vrot.slane %v786_v18, 9  ;;  %v821_v39 = vrot.slane %v341_v4, 5 }
  0x30   :  { %v536_v26 = vshrl.u32 %v352_v19, 16  ;;  %v539_v27 = vshll.u32 %v352_v19, 16  ;;  %v403_v30 = vrot.slane %v2713_v17, 5  ;;  %v1204_v31 = vpack.c.b16 %v1189_v22, %v1188_v15 }
  0x31   :  { %v553_v0 = vrot.slane %v552_v20, 4  ;;  %v407_v32 = vrot.slane %v2715_v25, 4  ;;  %v398_v38 = vor.u32 %v397_v29, %v394_v23  ;;  %v1025_v43 = vshrl.u32 %v786_v18, 16 }
  0x32   :  { %v2719_v35 = vld [vmem:[#allocation2 + $0x5c] sm:$0x1]  ;;  %v538_v36 = vrot.slane %v536_v26, 4  ;;  %v541_v37 = vrot.slane %v539_v27, 5  ;;  %2321 = vmatmul.msk.bf16.vlgmr.msra.gmra.mxu3 %vm592_vm15, %v1204_v31  ;;  %v1028_v44 = vshll.u32 %v786_v18, 16  ;;  %v822_v48 = vsel %vm2650_vm14, %v2294_v34, %v821_v39  ;;  %v71_v27 = vld [vmem:[#allocation3 + $0x30] sm:$0xff] }
  0x33   :  { %v555_v40 = vshll.u32 %v2719_v35, 16  ;;  %v408_v42 = vor.u32 %v407_v32, %v403_v30  ;;  %v357_v46 = vld [vmem:[#allocation2 + $0x14] sm:$0x1]  ;;  %v399_v47 = vrot.slane %v398_v38, 4  ;;  %v823_v50 = vrot.slane %v821_v39, 4  ;;  %v72_v32 = vld [vmem:[#allocation3 + $0x38] sm:$0xff] }
  0x34   :  { %v542_v45 = vor.u32 %v541_v37, %v538_v36  ;;  %v411_v53 = vshll.u32 %v357_v46, 16  ;;  %v824_v55 = vrot.slane %v357_v46, 5  ;;  %v873_v41 = vunpack.c.l.b16 %v822_v48  ;;  %v2731_v2 = vld [vmem:[#allocation2 + $0x14] sm:$0x3] }
  0x35   :  { %v557_v51 = vrot.slane %v555_v40, 5  ;;  %v409_v52 = vrot.slane %v408_v42, 4  ;;  %v404_v57 = vsel %vm2665_vm2, %v399_v47, %v403_v30  ;;  %v1027_v58 = vrot.slane %v1025_v43, 5  ;;  %v296_v47 = vld [vmem:[#allocation2 + $0x18] sm:$0xe] }
  0x36   :  { %v543_v56 = vrot.slane %v542_v45, 4  ;;  %v413_v62 = vrot.slane %v411_v53, 5  ;;  %v564_v63 = vunpack.c.l.b16 %v404_v57  ;;  %v825_v49 = vsel %vm2650_vm14, %v823_v50, %v824_v55 }
  0x37   :  { %v558_v61 = vsel %vm2665_vm2, %v553_v0, %v557_v51  ;;  %v874_v4 = vunpack.c.l.b16 %v825_v49  ;;  %v1030_v8 = vrot.slane %v1028_v44, 6  ;;  %v1033_v14 = vrot.slane %v2715_v25, 5  ;;  %v73_v44 = vld [vmem:[#allocation3 + $0x40] sm:$0xff] }
  0x38   :  { %v548_v54 = vsel %vm2665_vm2, %v543_v56, %v547_v7  ;;  %v577_v3 = vunpack.c.l.b16 %v558_v61  ;;  %v414_v13 = vsel %vm2665_vm2, %v409_v52, %v413_v62  ;;  %v1034_v15 = vrot.slane %v2713_v17, 6  ;;  %v300_v49 = vld [vmem:[#allocation2 + $0x20] sm:$0x3] }
  0x39   :  { %v576_v9 = vunpack.c.l.b16 %v548_v54  ;;  %v565_v16 = vunpack.c.l.b16 %v414_v13  ;;  %v888_v18 = vpack.c.b16 %v874_v4, %v873_v41  ;;  %v1031_v19 = vor.u32 %v1030_v8, %v1027_v58  ;;  %v74_v41 = vld [vmem:[#allocation3 + $0x48] sm:$0xff] }
  0x3a   :  { %v1039_v20 = vshrl.u32 %v2731_v2, 16  ;;  %v1035_v23 = vor.u32 %v1034_v15, %v1033_v14  ;;  %v1042_v7 = vshll.u32 %v2731_v2, 16  ;;  %v139_v26 = vshrl.u32 %v2702_v5, 16  ;;  %v303_v15 = vld [vmem:[#allocation2 + $0x24] sm:$0xe] }
  0x3b   :  { %v585_v22 = vpack.c.b16 %v577_v3, %v576_v9  ;;  %v579_v29 = vpack.c.b16 %v565_v16, %v564_v63  ;;  %2308 = vmatmul.msk.bf16.gmra.mxu2 %vm592_vm15, %v888_v18  ;;  %v1032_v30 = vrot.slane %v1031_v19, 4  ;;  %v142_v31 = vshll.u32 %v2702_v5, 16 }
  0x3c   :  { %v1041_v0 = vrot.slane %v1039_v20, 5  ;;  %v1037_v34 = vrot.slane %v1035_v23, 4  ;;  %v1044_v36 = vrot.slane %v1042_v7, 6  ;;  %v141_v37 = vrot.slane %v139_v26, 6  ;;  %v307_v7 = vld [vmem:[#allocation2 + $0x2c] sm:$0x3] }
  0x3d   :  { %2248 = vmatmul.msk.bf16.vlgmr.msra.gmra.mxu1 %vm592_vm15, %v585_v22  ;;  %v148_v38 = vshrl.u32 %v2704_v6, 16  ;;  %2242 = vmatmul.msk.bf16.gmra.mxu0 %vm592_vm15, %v579_v29  ;;  %v1036_v39 = vsel %vm2692_vm4, %v1032_v30, %v1035_v23  ;;  %v144_v40 = vrot.slane %v142_v31, 7  ;;  %v151_v42 = vshll.u32 %v2704_v6, 16 }
  0x3e   :  { %v87_v43 = vpack.c.bf16 %v71_v27, %v71_v27  ;;  %v1045_v45 = vor.u32 %v1044_v36, %v1041_v0  ;;  %v1190_v5 = vunpack.c.l.b16 %v1036_v39  ;;  %v88_v48 = vpack.c.bf16 %v72_v32, %v72_v32 }
  0x3f   :  { %v150_v46 = vrot.slane %v148_v38, 6  ;;  %v145_v50 = vor.u32 %v144_v40, %v141_v37  ;;  %v153_v51 = vrot.slane %v151_v42, 7  ;;  %v89_v58 = vpack.c.bf16 %v73_v44, %v73_v44  ;;  %v2427_v37 = vld [vmem:[#allocation2] sm:$0xff]  ;;  %v310_v40 = vld [vmem:[#allocation2 + $0x30] sm:$0xe] }
  0x40   :  { %v158_v52 = vshrl.u32 %v87_v43, 16  ;;  %v161_v53 = vshll.u32 %v87_v43, 16  ;;  %v1046_v55 = vsel %vm2692_vm4, %v1037_v34, %v1045_v45  ;;  %v167_v56 = vshrl.u32 %v88_v48, 16 }
  0x41   :  { %v170_v57 = vshll.u32 %v88_v48, 16  ;;  %v1191_v61 = vunpack.c.l.b16 %v1046_v55  ;;  %v146_v6 = vrot.slane %v145_v50, 4  ;;  %v154_v62 = vor.u32 %v153_v51, %v150_v46 }
  0x42   :  { %v297_v63 = vsel %vm2577_vm7, %v145_v50, %v296_v47  ;;  %v160_v54 = vrot.slane %v158_v52, 6  ;;  %v163_v3 = vrot.slane %v161_v53, 7  ;;  %v169_v4 = vrot.slane %v167_v56, 6 }
  0x43   :  { %298 = vst [vmem:[#allocation2 + $0x18] sm:$0xe] %v297_v63  ;;  %v172_v8 = vrot.slane %v170_v57, 7  ;;  %v1205_v9 = vpack.c.b16 %v1191_v61, %v1190_v5  ;;  %v155_v13 = vsel %vm2585_vm8, %v146_v6, %v154_v62  ;;  %v156_v14 = vrot.slane %v154_v62, 4 }
  0x44   :  { %v90_v16 = vpack.c.bf16 %v74_v41, %v74_v41  ;;  %299 = vst.msk [vmem:[#allocation2 + $0x1c] sm:$0xf] %vm39_vm0, %v155_v13  ;;  %v164_v18 = vor.u32 %v163_v3, %v160_v54  ;;  %v177_v20 = vshrl.u32 %v89_v58, 16  ;;  %v180_v22 = vshll.u32 %v89_v58, 16 }
  0x45   :  { %v173_v19 = vor.u32 %v172_v8, %v169_v4  ;;  %2322 = vmatmul.msk.bf16.gmra.mxu3 %vm592_vm15, %v1205_v9  ;;  %v301_v23 = vsel %vm2593_vm9, %v156_v14, %v300_v49 }
  0x46   :  { %v186_v26 = vshrl.u32 %v90_v16, 16  ;;  %v189_v27 = vshll.u32 %v90_v16, 16  ;;  %302 = vst [vmem:[#allocation2 + $0x20] sm:$0x3] %v301_v23  ;;  %v165_v29 = vrot.slane %v164_v18, 4  ;;  %v304_v0 = vsel %vm2577_vm7, %v164_v18, %v303_v15 }
  0x47   :  { %v175_v30 = vrot.slane %v173_v19, 4  ;;  %v179_v31 = vrot.slane %v177_v20, 6  ;;  %305 = vst [vmem:[#allocation2 + $0x24] sm:$0xe] %v304_v0  ;;  %v182_v32 = vrot.slane %v180_v22, 7 }
  0x48   :  { %v188_v34 = vrot.slane %v186_v26, 6  ;;  %v191_v36 = vrot.slane %v189_v27, 7  ;;  %v174_v38 = vsel %vm2585_vm8, %v165_v29, %v173_v19 }
  0x49   :  { %v308_v39 = vsel %vm2593_vm9, %v175_v30, %v307_v7  ;;  %306 = vst.msk [vmem:[#allocation2 + $0x28] sm:$0xf] %vm39_vm0, %v174_v38  ;;  %v183_v44 = vor.u32 %v182_v32, %v179_v31 }
  0x4a   :  { %v342_v42 = vld [vmem:[#allocation2 + $0x18] sm:$0xf]  ;;  %v2767_v45 = vor.u32 %v191_v36, %v188_v34  ;;  %309 = vst [vmem:[#allocation2 + $0x2c] sm:$0x3] %v308_v39 }
  0x4b   :  { %v787_v43 = vld [vmem:[#allocation2 + $0x18] sm:$0xe]  ;;  %v416_v5 = vshrl.u32 %v342_v42, 16  ;;  %v419_v46 = vshll.u32 %v342_v42, 16  ;;  %v2769_v48 = vld [vmem:[#allocation2 + $0x1c] sm:$0xf]  ;;  %v311_v53 = vsel %vm2577_vm7, %v183_v44, %v310_v40 }
  0x4c   :  { %v1048_v47 = vshrl.u32 %v787_v43, 16  ;;  %v2295_v50 = vrot.slane %v787_v43, 9  ;;  %v1051_v51 = vshll.u32 %v787_v43, 16  ;;  %v184_v52 = vrot.slane %v183_v44, 4  ;;  %312 = vst [vmem:[#allocation2 + $0x30] sm:$0xe] %v311_v53 }
  0x4d   :  { %2285 = vmatmul.msk.bf16.vlgmr.msrb.gmra.mxu1 %vm592_vm15, %v2427_v37  ;;  %v418_v55 = vrot.slane %v416_v5, 4  ;;  %v421_v56 = vrot.slane %v419_v46, 5  ;;  %v2775_v57 = vshll.u32 %v2769_v48, 16  ;;  %v2778_v41 = vshrl.u32 %v2769_v48, 16  ;;  %v358_v58 = vld [vmem:[#allocation2 + $0x20] sm:$0x1] }
  0x4e   :  { %v828_v61 = vrot.slane %v2769_v48, 5  ;;  %v1050_v6 = vrot.slane %v1048_v47, 5  ;;  %v193_v62 = vsel %vm2585_vm8, %v184_v52, %v2767_v45  ;;  %v194_v63 = vrot.slane %v2767_v45, 4  ;;  %v2789_v14 = vld [vmem:[#allocation2 + $0x20] sm:$0x3] }
  0x4f   :  { %v422_v49 = vor.u32 %v421_v56, %v418_v55  ;;  %v427_v54 = vrot.slane %v2775_v57, 5  ;;  %v431_v3 = vrot.slane %v2778_v41, 4  ;;  %v435_v4 = vshll.u32 %v358_v58, 16  ;;  %313 = vst.msk [vmem:[#allocation2 + $0x34] sm:$0xf] %vm39_vm0, %v193_v62 }
  0x50   :  { %v829_v8 = vsel %vm2650_vm14, %v2295_v50, %v828_v61  ;;  %v830_v9 = vrot.slane %v828_v61, 4  ;;  %v831_v13 = vrot.slane %v358_v58, 5  ;;  %v1053_v15 = vrot.slane %v1051_v51, 6  ;;  %v344_v27 = vld [vmem:[#allocation2 + $0x24] sm:$0xf] }
  0x51   :  { %v423_v16 = vrot.slane %v422_v49, 4  ;;  %v432_v18 = vor.u32 %v431_v3, %v427_v54  ;;  %v437_v19 = vrot.slane %v435_v4, 5  ;;  %v875_v20 = vunpack.c.l.b16 %v829_v8  ;;  %v2800_v38 = vld [vmem:[#allocation2 + $0x28] sm:$0xf]  ;;  %v359_v43 = vld [vmem:[#allocation2 + $0x2c] sm:$0x1] }
  0x52   :  { %v832_v22 = vsel %vm2650_vm14, %v830_v9, %v831_v13  ;;  %v1054_v23 = vor.u32 %v1053_v15, %v1050_v6  ;;  %v1056_v7 = vrot.slane %v2778_v41, 5  ;;  %v1057_v26 = vrot.slane %v2775_v57, 6  ;;  %v788_v51 = vld [vmem:[#allocation2 + $0x24] sm:$0xe]  ;;  %v2428_v49 = vld [vmem:[#allocation2 + $0xc] sm:$0xff] }
  0x53   :  { %v428_v29 = vsel %vm2665_vm2, %v423_v16, %v427_v54  ;;  %v433_v30 = vrot.slane %v432_v18, 4  ;;  %v876_v0 = vunpack.c.l.b16 %v832_v22  ;;  %v1062_v31 = vshrl.u32 %v2789_v14, 16 }
  0x54   :  { %v566_v32 = vunpack.c.l.b16 %v428_v29  ;;  %v1055_v34 = vrot.slane %v1054_v23, 4  ;;  %v1058_v36 = vor.u32 %v1057_v26, %v1056_v7  ;;  %v1065_v37 = vshll.u32 %v2789_v14, 16  ;;  %v2821_v26 = vld [vmem:[#allocation2 + $0x2c] sm:$0x3] }
  0x55   :  { %v438_v39 = vsel %vm2665_vm2, %v433_v30, %v437_v19  ;;  %v889_v40 = vpack.c.b16 %v876_v0, %v875_v20  ;;  %v1064_v42 = vrot.slane %v1062_v31, 5  ;;  %v440_v44 = vshrl.u32 %v344_v27, 16 }
  0x56   :  { %v567_v5 = vunpack.c.l.b16 %v438_v39  ;;  %v1059_v46 = vsel %vm2692_vm4, %v1055_v34, %v1058_v36  ;;  %v1060_v47 = vrot.slane %v1058_v36, 4  ;;  %v1067_v50 = vrot.slane %v1065_v37, 6 }
  0x57   :  { %2309 = vmatmul.msk.bf16.gmra.mxu2 %vm592_vm15, %v889_v40  ;;  %v1192_v52 = vunpack.c.l.b16 %v1059_v46  ;;  %v442_v53 = vrot.slane %v440_v44, 4  ;;  %v443_v55 = vshll.u32 %v344_v27, 16  ;;  %v2808_v56 = vshll.u32 %v2800_v38, 16  ;;  %v314_v40 = vld [vmem:[#allocation2 + $0x38] sm:$0x3] }
  0x58   :  { %v580_v58 = vpack.c.b16 %v567_v5, %v566_v32  ;;  %v1068_v61 = vor.u32 %v1067_v50, %v1064_v42  ;;  %v2811_v6 = vshrl.u32 %v2800_v38, 16  ;;  %v459_v62 = vshll.u32 %v359_v43, 16  ;;  %v346_v46 = vld [vmem:[#allocation2 + $0x30] sm:$0xf] }
  0x59   :  { %v445_v54 = vrot.slane %v443_v55, 5  ;;  %v451_v3 = vrot.slane %v2808_v56, 5  ;;  %v2296_v4 = vrot.slane %v788_v51, 9  ;;  %v835_v8 = vrot.slane %v2800_v38, 5 }
  0x5a   :  { %2243 = vmatmul.msk.bf16.gmra.mxu0 %vm592_vm15, %v580_v58  ;;  %v1069_v9 = vsel %vm2692_vm4, %v1060_v47, %v1068_v61  ;;  %v455_v13 = vrot.slane %v2811_v6, 4  ;;  %v461_v15 = vrot.slane %v459_v62, 5  ;;  %v838_v16 = vrot.slane %v359_v43, 5 }
  0x5b   :  { %v1193_v18 = vunpack.c.l.b16 %v1069_v9  ;;  %v446_v19 = vor.u32 %v445_v54, %v442_v53  ;;  %v836_v20 = vsel %vm2650_vm14, %v2296_v4, %v835_v8  ;;  %v837_v22 = vrot.slane %v835_v8, 4  ;;  %v2835_v53 = vld [vmem:[#allocation2 + $0x34] sm:$0xf]  ;;  %v789_v8 = vld [vmem:[#allocation2 + $0x30] sm:$0xe] }
  0x5c   :  { %v456_v23 = vor.u32 %v455_v13, %v451_v3  ;;  %v877_v7 = vunpack.c.l.b16 %v836_v20  ;;  %v1071_v27 = vshrl.u32 %v788_v51, 16  ;;  %v1074_v29 = vshll.u32 %v788_v51, 16 }
  0x5d   :  { %2286 = vmatmul.msk.bf16.gmra.mxu1 %vm592_vm15, %v2428_v49  ;;  %v1206_v30 = vpack.c.b16 %v1193_v18, %v1192_v52  ;;  %v447_v0 = vrot.slane %v446_v19, 4  ;;  %v839_v31 = vsel %vm2650_vm14, %v837_v22, %v838_v16  ;;  %v1079_v32 = vrot.slane %v2811_v6, 5 }
  0x5e   :  { %v457_v34 = vrot.slane %v456_v23, 4  ;;  %v878_v36 = vunpack.c.l.b16 %v839_v31  ;;  %v1073_v37 = vrot.slane %v1071_v27, 5  ;;  %v1076_v39 = vrot.slane %v1074_v29, 6 }
  0x5f   :  { %2323 = vmatmul.msk.bf16.gmra.mxu3 %vm592_vm15, %v1206_v30  ;;  %v452_v42 = vsel %vm2665_vm2, %v447_v0, %v451_v3  ;;  %v1080_v43 = vrot.slane %v2808_v56, 6  ;;  %v1085_v44 = vshrl.u32 %v2821_v26, 16  ;;  %v1088_v5 = vshll.u32 %v2821_v26, 16 }
  0x60   :  { %v462_v47 = vsel %vm2665_vm2, %v457_v34, %v461_v15  ;;  %v568_v50 = vunpack.c.l.b16 %v452_v42  ;;  %v890_v51 = vpack.c.b16 %v878_v36, %v877_v7  ;;  %v1077_v52 = vor.u32 %v1076_v39, %v1073_v37  ;;  %v75_v34 = vld [vmem:[#allocation3 + $0x50] sm:$0xff]  ;;  %v2429_v42 = vld [vmem:[#allocation2 + $0x18] sm:$0xff] }
  0x61   :  { %v569_v55 = vunpack.c.l.b16 %v462_v47  ;;  %v1081_v58 = vor.u32 %v1080_v43, %v1079_v32  ;;  %v1087_v61 = vrot.slane %v1085_v44, 5  ;;  %v1090_v62 = vrot.slane %v1088_v5, 6  ;;  %v76_v47 = vld [vmem:[#allocation3 + $0x58] sm:$0xff] }
  0x62   :  { %v1078_v49 = vrot.slane %v1077_v52, 4  ;;  %v315_v54 = vsel %vm2593_vm9, %v194_v63, %v314_v40  ;;  %v464_v3 = vshrl.u32 %v346_v46, 16  ;;  %v467_v4 = vshll.u32 %v346_v46, 16 }
  0x63   :  { %v581_v9 = vpack.c.b16 %v569_v55, %v568_v50  ;;  %v1083_v13 = vrot.slane %v1081_v58, 4  ;;  %v1091_v15 = vor.u32 %v1090_v62, %v1087_v61  ;;  %316 = vst [vmem:[#allocation2 + $0x38] sm:$0x3] %v315_v54  ;;  %v2842_v16 = vshll.u32 %v2835_v53, 16 }
  0x64   :  { %v1082_v18 = vsel %vm2692_vm4, %v1078_v49, %v1081_v58  ;;  %v466_v19 = vrot.slane %v464_v3, 4  ;;  %v469_v20 = vrot.slane %v467_v4, 5  ;;  %v2847_v45 = vshrl.u32 %v2835_v53, 16 }
  0x65   :  { %v1092_v63 = vsel %vm2692_vm4, %v1083_v13, %v1091_v15  ;;  %v1194_v22 = vunpack.c.l.b16 %v1082_v18  ;;  %v475_v23 = vrot.slane %v2842_v16, 5  ;;  %v2297_v7 = vrot.slane %v789_v8, 9 }
  0x66   :  { %v1195_v27 = vunpack.c.l.b16 %v1092_v63  ;;  %v470_v29 = vor.u32 %v469_v20, %v466_v19  ;;  %v479_v30 = vrot.slane %v2847_v45, 4  ;;  %v842_v0 = vrot.slane %v2835_v53, 5 }
  0x67   :  { %2310 = vmatmul.msk.bf16.gmra.mxu2 %vm592_vm15, %v890_v51  ;;  %v1094_v31 = vshrl.u32 %v789_v8, 16  ;;  %v1097_v32 = vshll.u32 %v789_v8, 16  ;;  %v1102_v39 = vrot.slane %v2847_v45, 5  ;;  %v1103_v40 = vrot.slane %v2842_v16, 6 }
  0x68   :  { %v480_v36 = vor.u32 %v479_v30, %v475_v23  ;;  %v843_v37 = vsel %vm2650_vm14, %v2297_v7, %v842_v0  ;;  %v471_v43 = vrot.slane %v470_v29, 4  ;;  %v844_v44 = vrot.slane %v842_v0, 4 }
  0x69   :  { %v1096_v5 = vrot.slane %v1094_v31, 5  ;;  %v1099_v46 = vrot.slane %v1097_v32, 6  ;;  %v1207_v50 = vpack.c.b16 %v1195_v27, %v1194_v22  ;;  %v879_v52 = vunpack.c.l.b16 %v843_v37  ;;  %v77_v27 = vld [vmem:[#allocation3 + $0x60] sm:$0xff]  ;;  %v78_v32 = vld [vmem:[#allocation3 + $0x68] sm:$0xff] }
  0x6a   :  { %2244 = vmatmul.msk.bf16.gmra.mxu0 %vm592_vm15, %v581_v9  ;;  %v360_v51 = vld [vmem:[#allocation2 + $0x38] sm:$0x1]  ;;  %v91_v58 = vpack.c.bf16 %v75_v34, %v75_v34  ;;  %v481_v61 = vrot.slane %v480_v36, 4  ;;  %v1104_v3 = vor.u32 %v1103_v40, %v1102_v39  ;;  %v92_v13 = vpack.c.bf16 %v76_v47, %v76_v47 }
  0x6b   :  { %v2860_v55 = vld [vmem:[#allocation2 + $0x38] sm:$0x3]  ;;  %v483_v62 = vshll.u32 %v360_v51, 16  ;;  %v845_v49 = vrot.slane %v360_v51, 5  ;;  %v1100_v54 = vor.u32 %v1099_v46, %v1096_v5  ;;  %v476_v9 = vsel %vm2665_vm2, %v471_v43, %v475_v23  ;;  %v317_v5 = vld [vmem:[#allocation2 + $0x3c] sm:$0xe] }
  0x6c   :  { %v1108_v4 = vshrl.u32 %v2860_v55, 16  ;;  %v1111_v8 = vshll.u32 %v2860_v55, 16  ;;  %v196_v19 = vshrl.u32 %v91_v58, 16  ;;  %v199_v7 = vshll.u32 %v91_v58, 16 }
  0x6d   :  { %2287 = vmatmul.msk.bf16.gmra.mxu1 %vm592_vm15, %v2429_v42  ;;  %v485_v15 = vrot.slane %v483_v62, 5  ;;  %v846_v18 = vsel %vm2650_vm14, %v844_v44, %v845_v49  ;;  %v1101_v20 = vrot.slane %v1100_v54, 4  ;;  %v205_v31 = vshrl.u32 %v92_v13, 16 }
  0x6e   :  { %v1110_v63 = vrot.slane %v1108_v4, 5  ;;  %v1113_v22 = vrot.slane %v1111_v8, 6  ;;  %v880_v30 = vunpack.c.l.b16 %v846_v18  ;;  %v198_v0 = vrot.slane %v196_v19, 6 }
  0x6f   :  { %2324 = vmatmul.msk.bf16.gmra.mxu3 %vm592_vm15, %v1207_v50  ;;  %v486_v29 = vsel %vm2665_vm2, %v481_v61, %v485_v15  ;;  %v570_v23 = vunpack.c.l.b16 %v476_v9  ;;  %v1106_v36 = vrot.slane %v1104_v3, 4  ;;  %v201_v39 = vrot.slane %v199_v7, 7  ;;  %v321_v15 = vld [vmem:[#allocation2 + $0x44] sm:$0x3] }
  0x70   :  { %v571_v34 = vunpack.c.l.b16 %v486_v29  ;;  %v1114_v37 = vor.u32 %v1113_v22, %v1110_v63  ;;  %v207_v40 = vrot.slane %v205_v31, 6  ;;  %v208_v42 = vshll.u32 %v92_v13, 16 }
  0x71   :  { %v93_v43 = vpack.c.bf16 %v77_v27, %v77_v27  ;;  %v1105_v44 = vsel %vm2692_vm4, %v1101_v20, %v1104_v3  ;;  %v94_v46 = vpack.c.bf16 %v78_v32, %v78_v32  ;;  %v891_v47 = vpack.c.b16 %v880_v30, %v879_v52  ;;  %v324_v27 = vld [vmem:[#allocation2 + $0x48] sm:$0xe]  ;;  %v328_v32 = vld [vmem:[#allocation2 + $0x50] sm:$0x3] }
  0x72   :  { %v202_v50 = vor.u32 %v201_v39, %v198_v0  ;;  %v210_v51 = vrot.slane %v208_v42, 7  ;;  %v1115_v61 = vsel %vm2692_vm4, %v1106_v36, %v1114_v37  ;;  %v582_v4 = vpack.c.b16 %v571_v34, %v570_v23  ;;  %v2430_v0 = vld [vmem:[#allocation2 + $0x24] sm:$0xff] }
  0x73   :  { %v215_v58 = vshrl.u32 %v93_v43, 16  ;;  %v218_v62 = vshll.u32 %v93_v43, 16  ;;  %v224_v49 = vshrl.u32 %v94_v46, 16  ;;  %v227_v54 = vshll.u32 %v94_v46, 16 }
  0x74   :  { %v203_v8 = vrot.slane %v202_v50, 4  ;;  %v211_v9 = vor.u32 %v210_v51, %v207_v40  ;;  %v318_v13 = vsel %vm2577_vm7, %v202_v50, %v317_v5  ;;  %v1196_v20 = vunpack.c.l.b16 %v1105_v44 }
  0x75   :  { %319 = vst [vmem:[#allocation2 + $0x3c] sm:$0xe] %v318_v13  ;;  %v217_v3 = vrot.slane %v215_v58, 6  ;;  %v220_v18 = vrot.slane %v218_v62, 7  ;;  %v226_v52 = vrot.slane %v224_v49, 6  ;;  %v229_v19 = vrot.slane %v227_v54, 7 }
  0x76   :  { %v1197_v63 = vunpack.c.l.b16 %v1115_v61  ;;  %v212_v22 = vsel %vm2585_vm8, %v203_v8, %v211_v9  ;;  %v213_v7 = vrot.slane %v211_v9, 4  ;;  %v2441_v49 = vld [vmem:[%s3358_s1 + $0x30] sm:$0xff] }
  0x77   :  { %2311 = vmatmul.msk.bf16.gmra.mxu2 %vm592_vm15, %v891_v47  ;;  %320 = vst.msk [vmem:[#allocation2 + $0x40] sm:$0xf] %vm39_vm0, %v212_v22  ;;  %v221_v29 = vor.u32 %v220_v18, %v217_v3  ;;  %v230_v30 = vor.u32 %v229_v19, %v226_v52 }
  0x78   :  { %v322_v31 = vsel %vm2593_vm9, %v213_v7, %v321_v15  ;;  %v1208_v37 = vpack.c.b16 %v1197_v63, %v1196_v20  ;;  %1973 = vmatpush.bf16.msrb.mxu2 %v2441_v49  ;;  %v2431_v49 = vld [vmem:[#allocation2 + $0x30] sm:$0xff] }
  0x79   :  { %323 = vst [vmem:[#allocation2 + $0x44] sm:$0x3] %v322_v31  ;;  %v222_v23 = vrot.slane %v221_v29, 4  ;;  %v232_v34 = vrot.slane %v230_v30, 4  ;;  %v325_v36 = vsel %vm2577_vm7, %v221_v29, %v324_v27  ;;  %vm1850_vm7 = vcmask 1040384  }
  0x7a   :  { %2245 = vmatmul.msk.bf16.gmra.mxu0 %vm592_vm15, %v582_v4  ;;  %326 = vst [vmem:[#allocation2 + $0x48] sm:$0xe] %v325_v36 }
  0x7b   :  { %v231_v39 = vsel %vm2585_vm8, %v222_v23, %v230_v30  ;;  %v329_v40 = vsel %vm2593_vm9, %v232_v34, %v328_v32  ;;  %vm1851_vm9 = vcmask 1044484  }
  0x7c   :  { %v348_v42 = vld [vmem:[#allocation2 + $0x3c] sm:$0xf]  ;;  %327 = vst.msk [vmem:[#allocation2 + $0x4c] sm:$0xf] %vm39_vm0, %v231_v39  ;;  %vm1331_vm0 = vcmask 1041408   ;;  %vm3007_vm10 = vmor %vm1850_vm7, %vm1851_vm9 }
  0x7d   :  { %2288 = vmatmul.msk.bf16.gmra.mxu1 %vm592_vm15, %v2430_v0  ;;  %v790_v43 = vld [vmem:[#allocation2 + $0x3c] sm:$0xe]  ;;  %v488_v44 = vshrl.u32 %v348_v42, 16  ;;  %v491_v5 = vshll.u32 %v348_v42, 16  ;;  %330 = vst [vmem:[#allocation2 + $0x50] sm:$0x3] %v329_v40  ;;  %vm2986_vm6 = vmor %vm1331_vm0, %vm1332_vm5 }
  0x7e   :  { %v1117_v46 = vshrl.u32 %v790_v43, 16  ;;  %v2894_v24 = vld [vmem:[#allocation2 + $0x40] sm:$0xf]  ;;  %v2298_v47 = vrot.slane %v790_v43, 9  ;;  %v1120_v50 = vshll.u32 %v790_v43, 16 }
  0x7f   :  { %2325 = vmatmul.msk.bf16.gmra.mxu3 %vm592_vm15, %v1208_v37  ;;  %v490_v51 = vrot.slane %v488_v44, 4  ;;  %v493_v58 = vrot.slane %v491_v5, 5  ;;  %v2900_v61 = vshll.u32 %v2894_v24, 16  ;;  %v2903_v62 = vshrl.u32 %v2894_v24, 16  ;;  %v2432_v21 = vld [vmem:[#allocation2 + $0x3c] sm:$0xff] }
  0x80   :  { %v361_v54 = vld [vmem:[#allocation2 + $0x44] sm:$0x1]  ;;  %v849_v4 = vrot.slane %v2894_v24, 5  ;;  %v1119_v8 = vrot.slane %v1117_v46, 5  ;;  %v1122_v63 = vrot.slane %v1120_v50, 6 }
  0x81   :  { %v494_v9 = vor.u32 %v493_v58, %v490_v51  ;;  %v499_v13 = vrot.slane %v2900_v61, 5  ;;  %v503_v15 = vrot.slane %v2903_v62, 4  ;;  %v507_v3 = vshll.u32 %v361_v54, 16  ;;  %v2913_v20 = vld [vmem:[#allocation2 + $0x44] sm:$0x3] }
  0x82   :  { %v850_v18 = vsel %vm2650_vm14, %v2298_v47, %v849_v4  ;;  %v851_v52 = vrot.slane %v849_v4, 4  ;;  %v852_v19 = vrot.slane %v361_v54, 5  ;;  %v1123_v0 = vor.u32 %v1122_v63, %v1119_v8  ;;  %v350_v23 = vld [vmem:[#allocation2 + $0x48] sm:$0xf] }
  0x83   :  { %v495_v22 = vrot.slane %v494_v9, 4  ;;  %v504_v7 = vor.u32 %v503_v15, %v499_v13  ;;  %v509_v27 = vrot.slane %v507_v3, 5  ;;  %v881_v29 = vunpack.c.l.b16 %v850_v18  ;;  %v2923_v5 = vld [vmem:[#allocation2 + $0x4c] sm:$0xf]  ;;  %v791_v9 = vld [vmem:[#allocation2 + $0x48] sm:$0xe] }
  0x84   :  { %v853_v30 = vsel %vm2650_vm14, %v851_v52, %v852_v19  ;;  %v1125_v31 = vrot.slane %v2903_v62, 5  ;;  %v1126_v32 = vrot.slane %v2900_v61, 6  ;;  %v1131_v39 = vshrl.u32 %v2913_v20, 16  ;;  %v362_v33 = vld [vmem:[#allocation2 + $0x50] sm:$0x1] }
  0x85   :  { %v500_v34 = vsel %vm2665_vm2, %v495_v22, %v499_v13  ;;  %v505_v36 = vrot.slane %v504_v7, 4  ;;  %v882_v37 = vunpack.c.l.b16 %v853_v30  ;;  %v1124_v42 = vrot.slane %v1123_v0, 4 }
  0x86   :  { %v572_v40 = vunpack.c.l.b16 %v500_v34  ;;  %v1127_v43 = vor.u32 %v1126_v32, %v1125_v31  ;;  %v1134_v44 = vshll.u32 %v2913_v20, 16  ;;  %v1133_v50 = vrot.slane %v1131_v39, 5  ;;  %v2440_v34 = vld [vmem:[%s3358_s1 + $0x28] sm:$0xff] }
  0x87   :  { %v510_v46 = vsel %vm2665_vm2, %v505_v36, %v509_v27  ;;  %v892_v47 = vpack.c.b16 %v882_v37, %v881_v29  ;;  %v512_v51 = vshrl.u32 %v350_v23, 16  ;;  %v515_v3 = vshll.u32 %v350_v23, 16  ;;  %1768 = vmatpush.bf16.msra.mxu1 %v2440_v34 }
  0x88   :  { %v573_v58 = vunpack.c.l.b16 %v510_v46  ;;  %v1128_v54 = vsel %vm2692_vm4, %v1124_v42, %v1127_v43  ;;  %v1129_v4 = vrot.slane %v1127_v43, 4  ;;  %v1136_v8 = vrot.slane %v1134_v44, 6  ;;  %v2948_v44 = vld [vmem:[#allocation2 + $0x50] sm:$0x3] }
  0x89   :  { %2312 = vmatmul.msk.bf16.gmra.mxu2 %vm592_vm15, %v892_v47  ;;  %v1198_v13 = vunpack.c.l.b16 %v1128_v54  ;;  %v514_v15 = vrot.slane %v512_v51, 4  ;;  %v2931_v18 = vshll.u32 %v2923_v5, 16  ;;  %v2934_v63 = vshrl.u32 %v2923_v5, 16 }
  0x8a   :  { %v583_v52 = vpack.c.b16 %v573_v58, %v572_v40  ;;  %v1137_v19 = vor.u32 %v1136_v8, %v1133_v50  ;;  %v531_v22 = vshll.u32 %v362_v33, 16  ;;  %v517_v7 = vrot.slane %v515_v3, 5 }
  0x8b   :  { %v523_v27 = vrot.slane %v2931_v18, 5  ;;  %v2299_v29 = vrot.slane %v791_v9, 9  ;;  %v856_v30 = vrot.slane %v2923_v5, 5  ;;  %v527_v31 = vrot.slane %v2934_v63, 4 }
  0x8c   :  { %2246 = vmatmul.msk.bf16.gmra.mxu0 %vm592_vm15, %v583_v52  ;;  %v1138_v0 = vsel %vm2692_vm4, %v1129_v4, %v1137_v19  ;;  %v533_v32 = vrot.slane %v531_v22, 5  ;;  %v859_v23 = vrot.slane %v362_v33, 5  ;;  %v518_v37 = vor.u32 %v517_v7, %v514_v15 }
  0x8d   :  { %2289 = vmatmul.msk.bf16.gmra.mxu1 %vm592_vm15, %v2431_v49  ;;  %v1199_v36 = vunpack.c.l.b16 %v1138_v0  ;;  %v857_v39 = vsel %vm2650_vm14, %v2299_v29, %v856_v30  ;;  %v858_v40 = vrot.slane %v856_v30, 4  ;;  %v528_v42 = vor.u32 %v527_v31, %v523_v27 }
  0x8e   :  { %v883_v43 = vunpack.c.l.b16 %v857_v39  ;;  %v1140_v46 = vshrl.u32 %v791_v9, 16  ;;  %v1143_v47 = vshll.u32 %v791_v9, 16  ;;  %v519_v51 = vrot.slane %v518_v37, 4  ;;  %v792_v39 = vld [vmem:[#allocation2 + $0x54] sm:$0xe] }
  0x8f   :  { %v1209_v50 = vpack.c.b16 %v1199_v36, %v1198_v13  ;;  %v860_v33 = vsel %vm2650_vm14, %v858_v40, %v859_v23  ;;  %v1148_v58 = vrot.slane %v2934_v63, 5  ;;  %v529_v49 = vrot.slane %v528_v42, 4 }
  0x90   :  { %v884_v54 = vunpack.c.l.b16 %v860_v33  ;;  %v1142_v4 = vrot.slane %v1140_v46, 5  ;;  %v1145_v8 = vrot.slane %v1143_v47, 6  ;;  %v524_v15 = vsel %vm2665_vm2, %v519_v51, %v523_v27  ;;  %v2966_v46 = vld [vmem:[#allocation2] sm:$0xc]  ;;  %v2968_v47 = vld [vmem:[#allocation2 + $0x4] sm:$0xf] }
  0x91   :  { %2326 = vmatmul.msk.bf16.gmra.mxu3 %vm592_vm15, %v1209_v50  ;;  %v1149_v3 = vrot.slane %v2931_v18, 6  ;;  %v1154_v9 = vshrl.u32 %v2948_v44, 16  ;;  %v1157_v13 = vshll.u32 %v2948_v44, 16  ;;  %v534_v52 = vsel %vm2665_vm2, %v529_v49, %v533_v32  ;;  %v2971_v50 = vld [vmem:[#allocation2 + $0x58] sm:$0xf] }
  0x92   :  { %v1146_v19 = vor.u32 %v1145_v8, %v1142_v4  ;;  %v574_v30 = vunpack.c.l.b16 %v524_v15  ;;  %v575_v0 = vunpack.c.l.b16 %v534_v52  ;;  %v893_v23 = vpack.c.b16 %v884_v54, %v883_v43  ;;  %v2975_v49 = vld [vmem:[#allocation2 + $0x5c] sm:$0x3] }
  0x93   :  { %v1150_v22 = vor.u32 %v1149_v3, %v1148_v58  ;;  %v1156_v7 = vrot.slane %v1154_v9, 5  ;;  %v1159_v29 = vrot.slane %v1157_v13, 6  ;;  %v1336_v43 = vrot.slane %v2968_v47, 6  ;;  %v2460_v13 = vld [vmem:[#allocation2 + $0x8] sm:$0x3] }
  0x94   :  { %v1147_v31 = vrot.slane %v1146_v19, 4  ;;  %v584_v40 = vpack.c.b16 %v575_v0, %v574_v30  ;;  %v863_v51 = vrot.slane %v2971_v50, 5  ;;  %v2300_v33 = vrot.slane %v792_v39, 9 }
  0x95   :  { %v1152_v34 = vrot.slane %v1150_v22, 4  ;;  %v1160_v36 = vor.u32 %v1159_v29, %v1156_v7  ;;  %v866_v58 = vrot.slane %v2719_v35, 5  ;;  %v1163_v54 = vshrl.u32 %v792_v39, 16 }
  0x96   :  { %v1151_v27 = vsel %vm2692_vm4, %v1147_v31, %v1150_v22  ;;  %v1166_v4 = vshll.u32 %v792_v39, 16  ;;  %v865_v8 = vrot.slane %v863_v51, 4  ;;  %v1171_v15 = vrot.slane %v2698_v1, 5 }
  0x97   :  { %v1161_v37 = vsel %vm2692_vm4, %v1152_v34, %v1160_v36  ;;  %v1200_v32 = vunpack.c.l.b16 %v1151_v27  ;;  %v1172_v3 = vrot.slane %v2696_v60, 6  ;;  %v2329_v9 = vrot.slane %v2966_v46, 10 }
  0x98   :  { %v1201_v42 = vunpack.c.l.b16 %v1161_v37  ;;  %v1339_v52 = vrot.slane %v2460_v13, 6  ;;  %v1165_v19 = vrot.slane %v1163_v54, 5  ;;  %v1168_v35 = vrot.slane %v1166_v4, 6 }
  0x99   :  { %2313 = vmatmul.msk.bf16.gmra.mxu2 %vm592_vm15, %v893_v23  ;;  %v1338_v7 = vrot.slane %v1336_v43, 4  ;;  %v1177_v29 = vshrl.u32 %v2975_v49, 16  ;;  %v1180_v30 = vshll.u32 %v2975_v49, 16  ;;  %v864_v31 = vsel %vm2650_vm14, %v2300_v33, %v863_v51 }
  0x9a   :  { %v1210_v22 = vpack.c.b16 %v1201_v42, %v1200_v32  ;;  %v867_v23 = vsel %vm2650_vm14, %v865_v8, %v866_v58  ;;  %v1169_v34 = vor.u32 %v1168_v35, %v1165_v19  ;;  %v1173_v36 = vor.u32 %v1172_v3, %v1171_v15  ;;  %v1826_v3 = vld [vmem:[#allocation2] sm:$0x8]  ;;  %v2461_v35 = vld [vmem:[#allocation2 + $0x10] sm:$0xf] }
  0x9b   :  { %v1179_v27 = vrot.slane %v1177_v29, 5  ;;  %v1182_v37 = vrot.slane %v1180_v30, 6  ;;  %v1337_v39 = vsel %vm2986_vm6, %v2329_v9, %v1336_v43  ;;  %v886_v32 = vunpack.c.l.b16 %v867_v23  ;;  %v1512_v43 = vld [vmem:[#allocation2 + $0x8] sm:$0x7] }
  0x9c   :  { %2247 = vmatmul.msk.bf16.gmra.mxu0 %vm592_vm15, %v584_v40  ;;  %v1340_v40 = vsel %vm2986_vm6, %v1338_v7, %v1339_v52  ;;  %v1170_v42 = vrot.slane %v1169_v34, 4  ;;  %v1175_v54 = vrot.slane %v1173_v36, 4  ;;  %v1393_v33 = vunpack.c.l.b16 %v1337_v39  ;;  %v2433_v9 = vld [vmem:[#allocation2 + $0x48] sm:$0xff] }
  0x9d   :  { %2290 = vmatmul.msk.bf16.gmra.mxu1 %vm592_vm15, %v2432_v21  ;;  %v885_v21 = vunpack.c.l.b16 %v864_v31  ;;  %v1183_v51 = vor.u32 %v1182_v37, %v1179_v27  ;;  %v1394_v12 = vunpack.c.l.b16 %v1340_v40  ;;  %v1855_v15 = vrot.slane %v2968_v47, 7  ;;  %v3005_v7 = vld [vmem:[#allocation2 + $0xc] sm:$0xc] }
  0x9e   :  { %v1174_v4 = vsel %vm2692_vm4, %v1170_v42, %v1173_v36  ;;  %v2365_v29 = vrot.slane %v1826_v3, 11  ;;  %v1858_v59 = vrot.slane %v1512_v43, 7  ;;  %v2330_v23 = vrot.slane %v3005_v7, 10 }
  0x9f   :  { %v894_v58 = vpack.c.b16 %v886_v32, %v885_v21  ;;  %v1184_v8 = vsel %vm2692_vm4, %v1175_v54, %v1183_v51  ;;  %v1409_v13 = vpack.c.b16 %v1394_v12, %v1393_v33  ;;  %v1202_v52 = vunpack.c.l.b16 %v1174_v4 }
  0xa0   :  { %v1203_v19 = vunpack.c.l.b16 %v1184_v8  ;;  %v1857_v30 = vrot.slane %v1855_v15, 4  ;;  %v1346_v36 = vrot.slane %v2731_v2, 6  ;;  %v1856_v37 = vsel %vm3007_vm10, %v2365_v29, %v1855_v15 }
  0xa1   :  { %2327 = vmatmul.msk.bf16.gmra.mxu3 %vm592_vm15, %v1210_v22  ;;  %v1343_v22 = vrot.slane %v2461_v35, 6  ;;  %v1521_v40 = vshrl.u32 %v2966_v46, 16  ;;  %v1524_v21 = vshll.u32 %v2966_v46, 16  ;;  %v1912_v42 = vunpack.c.l.b16 %v1856_v37 }
  0xa2   :  { %v1211_v47 = vpack.c.b16 %v1203_v19, %v1202_v52  ;;  %v1859_v39 = vsel %vm3007_vm10, %v1857_v30, %v1858_v59  ;;  %v1530_v33 = vrot.slane %v2644_v10, 7  ;;  %v1535_v15 = vshrl.u32 %v1512_v43, 16  ;;  %v1513_v52 = vld [vmem:[#allocation2 + $0x14] sm:$0x7]  ;;  %v1827_v19 = vld [vmem:[#allocation2 + $0xc] sm:$0x8] }
  0xa3   :  { %v1345_v34 = vrot.slane %v1343_v22, 4  ;;  %v1344_v32 = vsel %vm2986_vm6, %v2330_v23, %v1343_v22  ;;  %v1913_v54 = vunpack.c.l.b16 %v1859_v39  ;;  %v1523_v12 = vrot.slane %v1521_v40, 6  ;;  %v2434_v22 = vld [vmem:[#allocation2 + $0x54] sm:$0xff] }
  0xa4   :  { %v1395_v4 = vunpack.c.l.b16 %v1344_v32  ;;  %v1538_v46 = vshll.u32 %v1512_v43, 16  ;;  %v1350_v59 = vrot.slane %v2769_v48, 6  ;;  %v1537_v10 = vrot.slane %v1535_v15, 6 }
  0xa5   :  { %v1347_v2 = vsel %vm2986_vm6, %v1345_v34, %v1346_v36  ;;  %v1928_v3 = vpack.c.b16 %v1913_v54, %v1912_v42  ;;  %v3038_v34 = vld [vmem:[#allocation2 + $0x18] sm:$0xc]  ;;  %v1865_v37 = vrot.slane %v1513_v52, 7  ;;  %v1353_v32 = vrot.slane %v2789_v14, 6 }
  0xa6   :  { %v1396_v8 = vunpack.c.l.b16 %v1347_v2  ;;  %v1540_v23 = vrot.slane %v1538_v46, 7  ;;  %v2331_v40 = vrot.slane %v3038_v34, 10  ;;  %v1668_v0 = vrot.slane %v2931_v18, 7 }
  0xa8   :  { %v1410_v29 = vpack.c.b16 %v1396_v8, %v1395_v4  ;;  %v1541_v54 = vor.u32 %v1540_v23, %v1537_v10  ;;  %v1547_v4 = vshll.u32 %v3005_v7, 16  ;;  %v1351_v8 = vsel %vm2986_vm6, %v2331_v40, %v1350_v59 }
  0xa9   :  { %2314 = vmatmul.msk.bf16.gmra.mxu2 %vm592_vm15, %v894_v58  ;;  %v1526_v58 = vrot.slane %v1524_v21, 7  ;;  %v1352_v21 = vrot.slane %v1350_v59, 4  ;;  %v1553_v59 = vrot.slane %v2713_v17, 7  ;;  %v1558_v10 = vshrl.u32 %v1513_v52, 16 }
  0xaa   :  { %v3015_v27 = vpop.f32.mrf.mxu0  ;;  %v1561_v23 = vshll.u32 %v1513_v52, 16 }
  0xab   :  { %v1527_v43 = vor.u32 %v1526_v58, %v1523_v12  ;;  %v1544_v58 = vshrl.u32 %v3005_v7, 16  ;;  %v1354_v15 = vsel %vm2986_vm6, %v1352_v21, %v1353_v32  ;;  %v1549_v7 = vrot.slane %v1547_v4, 7 }
  0xac   :  { %2343 = vmatmul.msk.bf16.vlgmr.msrb.gmra.mxu0 %vm592_vm15, %v1409_v13  ;;  %v1862_v13 = vrot.slane %v2461_v35, 7  ;;  %v1869_v21 = vrot.slane %v2769_v48, 7  ;;  %v1357_v32 = vrot.slane %v2800_v38, 6  ;;  %v1563_v52 = vrot.slane %v1561_v23, 7 }
  0xad   :  { %2291 = vmatmul.msk.bf16.gmra.mxu1 %vm592_vm15, %v2433_v9  ;;  %v3028_v51 = vpop.f32.mrf.mxu2  ;;  %v1529_v9 = vrot.slane %v2646_v11, 6  ;;  %v2366_v11 = vrot.slane %v1827_v19, 11  ;;  %v1528_v2 = vrot.slane %v1527_v43, 4  ;;  %v1397_v43 = vunpack.c.l.b16 %v1351_v8 }
  0xae   :  { %v1864_v35 = vrot.slane %v1862_v13, 4 }
  0xaf   :  { %v1531_v36 = vor.u32 %v1530_v33, %v1529_v9  ;;  %v1863_v33 = vsel %vm3007_vm10, %v2366_v11, %v1862_v13  ;;  %v1398_v11 = vunpack.c.l.b16 %v1354_v15  ;;  %v1871_v15 = vrot.slane %v1869_v21, 4 }
  0xb0   :  { %v1866_v12 = vsel %vm3007_vm10, %v1864_v35, %v1865_v37  ;;  %v1914_v9 = vunpack.c.l.b16 %v1863_v33  ;;  %v1560_v33 = vrot.slane %v1558_v10, 6 }
  0xb1   :  { %2328 = vmatmul.msk.bf16.gmra.mxu3 %vm592_vm15, %v1211_v47  ;;  %v1533_v42 = vrot.slane %v1531_v36, 4  ;;  %v1532_v46 = vsel %vm2585_vm8, %v1528_v2, %v1531_v36  ;;  %v1915_v13 = vunpack.c.l.b16 %v1866_v12  ;;  %v3070_v2 = vld [vmem:[#allocation2 + $0x20] sm:$0x7]  ;;  %v1411_v12 = vpack.c.b16 %v1398_v11, %v1397_v43 }
  0xb2   :  { %v3032_v30 = vpop.f32.mrf.mxu0  ;;  %v1707_v35 = vunpack.c.l.b16 %v1532_v46  ;;  %v1872_v48 = vrot.slane %v3070_v2, 7 }
  0xb3   :  { %v1929_v36 = vpack.c.b16 %v1915_v13, %v1914_v9  ;;  %v1359_v9 = vrot.slane %v1357_v32, 4  ;;  %v1360_v13 = vrot.slane %v2821_v26, 6 }
  0xb4   :  { %v1873_v23 = vsel %vm3007_vm10, %v1871_v15, %v1872_v48  ;;  %v1575_v48 = vrot.slane %v2778_v41, 6 }
  0xb5   :  { %v3040_v39 = vpop.f32.mrf.mxu2  ;;  %v1361_v11 = vsel %vm2986_vm6, %v1359_v9, %v1360_v13  ;;  %v1515_v13 = vld [vmem:[#allocation2 + $0x2c] sm:$0x7] }
  0xb9   :  { %2379 = vmatmul.msk.bf16.vlgmr.msrb.gmra.mxu2 %vm592_vm15, %v1928_v3  ;;  %v1542_v3 = vsel %vm2585_vm8, %v1533_v42, %v1541_v54  ;;  %v1828_v42 = vld [vmem:[#allocation2 + $0x18] sm:$0x8]  ;;  %v3072_v54 = vld [vmem:[#allocation2 + $0x24] sm:$0xc] }
  0xba   :  { %v3035_v47 = vpop.f32.mrf.mxu1  ;;  %v3062_v19 = vpop.f32.mrf.mxu0  ;;  %v1708_v37 = vunpack.c.l.b16 %v1542_v3  ;;  %v2367_v8 = vrot.slane %v1828_v42, 11  ;;  %v2332_v3 = vrot.slane %v3072_v54, 10  ;;  %v1570_v42 = vshll.u32 %v3038_v34, 16 }
  0xbc   :  { %2344 = vmatmul.msk.bf16.gmra.mxu0 %vm592_vm15, %v1410_v29  ;;  %v1552_v29 = vrot.slane %v2715_v25, 6  ;;  %v1358_v26 = vsel %vm2986_vm6, %v2332_v3, %v1357_v32  ;;  %v1400_v32 = vunpack.c.l.b16 %v1361_v11  ;;  %v1572_v15 = vrot.slane %v1570_v42, 7 }
  0xbd   :  { %2292 = vmatmul.msk.bf16.gmra.mxu1 %vm592_vm15, %v2434_v22  ;;  %v1546_v22 = vrot.slane %v1544_v58, 6  ;;  %v1723_v58 = vpack.c.b16 %v1708_v37, %v1707_v35  ;;  %v1581_v3 = vshrl.u32 %v3070_v2, 16 }
  0xbe   :  { %v3066_v40 = vpop.f32.mrf.mxu2  ;;  %v1554_v17 = vor.u32 %v1553_v59, %v1552_v29  ;;  %v1564_v29 = vor.u32 %v1563_v52, %v1560_v33  ;;  %v1399_v52 = vunpack.c.l.b16 %v1358_v26 }
  0xbf   :  { %v1550_v25 = vor.u32 %v1549_v7, %v1546_v22 }
  0xc0   :  { %v1556_v7 = vrot.slane %v1554_v17, 4 }
  0xc1   :  { %v1551_v22 = vrot.slane %v1550_v25, 4 }
  0xc2   :  { %v3056_v14 = vpop.f32.mrf.mxu1  ;;  %v3084_v10 = vpop.f32.mrf.mxu0  ;;  %v1565_v35 = vsel %vm2585_vm8, %v1556_v7, %v1564_v29  ;;  %v1412_v7 = vpack.c.b16 %v1400_v32, %v1399_v52  ;;  %v1364_v29 = vrot.slane %v2835_v53, 6 }
  0xc4   :  { %v1366_v42 = vrot.slane %v1364_v29, 4 }
  0xc6   :  { %v3090_v43 = vpop.f32.mrf.mxu2 }
  0xc9   :  { %2380 = vmatmul.msk.bf16.gmra.mxu2 %vm592_vm15, %v1929_v36  ;;  %v1917_v36 = vunpack.c.l.b16 %v1873_v23 }
  0xca   :  { %v745_v4 = vpop.f32.mrf.mxu1 }
  0xcb   :  { %v746_v46 = vadd.f32 %v745_v4, %v3015_v27  ;;  %v1870_v27 = vsel %vm3007_vm10, %v2367_v8, %v1869_v21  ;;  %v1567_v21 = vshrl.u32 %v3038_v34, 16  ;;  %v1584_v34 = vshll.u32 %v3070_v2, 16 }
  0xcc   :  { %2345 = vmatmul.msk.bf16.gmra.mxu0 %vm592_vm15, %v1411_v12  ;;  %v1916_v37 = vunpack.c.l.b16 %v1870_v27  ;;  %v1583_v2 = vrot.slane %v1581_v3, 6 }
  0xcd   :  { %2357 = vmatmul.msk.bf16.vlgmr.msra.gmra.mxu1 %vm592_vm15, %v1723_v58  ;;  %v3082_v59 = vadd.f32 %v3028_v51, %v746_v46  ;;  %v1555_v51 = vsel %vm2585_vm8, %v1551_v22, %v1554_v17  ;;  %v1710_v58 = vunpack.c.l.b16 %v1565_v35  ;;  %v1569_v8 = vrot.slane %v1567_v21, 6  ;;  %v1829_v22 = vld [vmem:[#allocation2 + $0x24] sm:$0x8] }
  0xce   :  { %v1709_v12 = vunpack.c.l.b16 %v1555_v51  ;;  %v1930_v17 = vpack.c.b16 %v1917_v36, %v1916_v37  ;;  %v1576_v46 = vrot.slane %v2775_v57, 7  ;;  %v3117_v57 = vld [vmem:[#allocation2 + $0x30] sm:$0xc]  ;;  %v1586_v11 = vrot.slane %v1584_v34, 7 }
  0xcf   :  { %v1573_v23 = vor.u32 %v1572_v15, %v1569_v8  ;;  %v1879_v37 = vrot.slane %v1515_v13, 7  ;;  %v2333_v21 = vrot.slane %v3117_v57, 10 }
  0xd0   :  { %v1577_v26 = vor.u32 %v1576_v46, %v1575_v48  ;;  %v1587_v32 = vor.u32 %v1586_v11, %v1583_v2  ;;  %v1604_v11 = vshrl.u32 %v1515_v13, 16 }
  0xd1   :  { %v1365_v8 = vsel %vm2986_vm6, %v2333_v21, %v1364_v29  ;;  %v1516_v21 = vld [vmem:[#allocation2 + $0x38] sm:$0x7] }
  0xd2   :  { %v747_v25 = vpop.f32.mrf.mxu1  ;;  %v1579_v52 = vrot.slane %v1577_v26, 4 }
  0xd3   :  { %v748_v33 = vadd.f32 %v747_v25, %v3032_v30  ;;  %v1876_v30 = vrot.slane %v2800_v38, 7  ;;  %v2368_v38 = vrot.slane %v1829_v22, 11  ;;  %v1367_v25 = vrot.slane %v2860_v55, 6 }
  0xd4   :  { %v1588_v3 = vsel %vm2585_vm8, %v1579_v52, %v1587_v32  ;;  %v3154_v52 = vld [vmem:[#allocation2 + $0x3c] sm:$0xc] }
  0xd5   :  { %v3104_v4 = vadd.f32 %v3040_v39, %v748_v33  ;;  %v1724_v39 = vpack.c.b16 %v1710_v58, %v1709_v12  ;;  %v1878_v35 = vrot.slane %v1876_v30, 4  ;;  %v1574_v33 = vrot.slane %v1573_v23, 4 }
  0xd6   :  { %v1368_v55 = vsel %vm2986_vm6, %v1366_v42, %v1367_v25  ;;  %v1712_v2 = vunpack.c.l.b16 %v1588_v3  ;;  %v1830_v42 = vld [vmem:[#allocation2 + $0x30] sm:$0x8]  ;;  %v1374_v3 = vrot.slane %v2913_v20, 6 }
  0xd7   :  { %v3110_v9 = vpop.f32.mrf.mxu0  ;;  %v1880_v58 = vsel %vm3007_vm10, %v1878_v35, %v1879_v37  ;;  %v1578_v46 = vsel %vm2585_vm8, %v1574_v33, %v1577_v26  ;;  %v1402_v29 = vunpack.c.l.b16 %v1368_v55  ;;  %v1598_v26 = vrot.slane %v2811_v6, 6 }
  0xd8   :  { %v1711_v23 = vunpack.c.l.b16 %v1578_v46  ;;  %v1599_v35 = vrot.slane %v2808_v56, 7  ;;  %v2334_v55 = vrot.slane %v3154_v52, 10 }
  0xd9   :  { %2381 = vmatmul.msk.bf16.gmra.mxu2 %vm592_vm15, %v1930_v17  ;;  %v1590_v17 = vshrl.u32 %v3072_v54, 16 }
  0xda   :  { %v750_v27 = vpop.f32.mrf.mxu1  ;;  %v3115_v41 = vpop.f32.mrf.mxu2  ;;  %v1725_v33 = vpack.c.b16 %v1712_v2, %v1711_v23 }
  0xdb   :  { %v751_v51 = vadd.f32 %v750_v27, %v3062_v19  ;;  %v1877_v19 = vsel %vm3007_vm10, %v2368_v38, %v1876_v30  ;;  %v1919_v30 = vunpack.c.l.b16 %v1880_v58  ;;  %v1600_v58 = vor.u32 %v1599_v35, %v1598_v26 }
  0xdc   :  { %2346 = vmatmul.msk.bf16.gmra.mxu0 %vm592_vm15, %v1412_v7  ;;  %v1918_v34 = vunpack.c.l.b16 %v1877_v19  ;;  %v1606_v19 = vrot.slane %v1604_v11, 6 }
  0xdd   :  { %2358 = vmatmul.msk.bf16.gmra.mxu1 %vm592_vm15, %v1724_v39  ;;  %v3123_v36 = vadd.f32 %v3066_v40, %v751_v51  ;;  %v1593_v40 = vshll.u32 %v3072_v54, 16  ;;  %v1592_v54 = vrot.slane %v1590_v17, 6  ;;  %v1401_v39 = vunpack.c.l.b16 %v1365_v8 }
  0xde   :  { %v1607_v51 = vshll.u32 %v1515_v13, 16  ;;  %v1931_v38 = vpack.c.b16 %v1919_v30, %v1918_v34  ;;  %v1886_v8 = vrot.slane %v1516_v21, 7  ;;  %v1602_v30 = vrot.slane %v1600_v58, 4 }
  0xdf   :  { %v3127_v12 = vpop.f32.mrf.mxu0  ;;  %v1595_v7 = vrot.slane %v1593_v40, 7  ;;  %v1413_v25 = vpack.c.b16 %v1402_v29, %v1401_v39 }
  0xe0   :  { %v1609_v13 = vrot.slane %v1607_v51, 7 }
  0xe1   :  { %v1596_v56 = vor.u32 %v1595_v7, %v1592_v54  ;;  %v1616_v54 = vshll.u32 %v3117_v57, 16 }
  0xe2   :  { %v752_v15 = vpop.f32.mrf.mxu1  ;;  %v3139_v48 = vpop.f32.mrf.mxu2 }
  0xe3   :  { %v753_v22 = vadd.f32 %v752_v15, %v3084_v10  ;;  %v1883_v10 = vrot.slane %v2835_v53, 7  ;;  %v2369_v53 = vrot.slane %v1830_v42, 11  ;;  %v1597_v34 = vrot.slane %v1596_v56, 4 }
  0xe4   :  { %v1618_v35 = vrot.slane %v1616_v54, 7 }
  0xe5   :  { %v3147_v27 = vadd.f32 %v3090_v43, %v753_v22  ;;  %v1371_v43 = vrot.slane %v2894_v24, 6  ;;  %v1885_v40 = vrot.slane %v1883_v10, 4  ;;  %v1610_v22 = vor.u32 %v1609_v13, %v1606_v19 }
  0xe6   :  { %v1884_v39 = vsel %vm3007_vm10, %v2369_v53, %v1883_v10  ;;  %v1890_v53 = vrot.slane %v2894_v24, 7 }
  0xe7   :  { %v3151_v37 = vpop.f32.mrf.mxu0  ;;  %v1373_v46 = vrot.slane %v1371_v43, 4  ;;  %v1887_v29 = vsel %vm3007_vm10, %v1885_v40, %v1886_v8  ;;  %v1611_v11 = vsel %vm2585_vm8, %v1602_v30, %v1610_v22  ;;  %v1920_v51 = vunpack.c.l.b16 %v1884_v39  ;;  %v3196_v8 = vld [vmem:[#allocation2 + $0x44] sm:$0x7] }
  0xe8   :  { %v1893_v54 = vrot.slane %v3196_v8, 7 }
  0xe9   :  { %2382 = vmatmul.msk.bf16.gmra.mxu2 %vm592_vm15, %v1931_v38  ;;  %v1375_v20 = vsel %vm2986_vm6, %v1373_v46, %v1374_v3  ;;  %v1921_v38 = vunpack.c.l.b16 %v1887_v29 }
  0xea   :  { %v755_v32 = vpop.f32.mrf.mxu1  ;;  %v3158_v6 = vpop.f32.mrf.mxu2  ;;  %v1404_v13 = vunpack.c.l.b16 %v1375_v20  ;;  %v1381_v20 = vrot.slane %v2948_v44, 6 }
  0xeb   :  { %v756_v17 = vadd.f32 %v755_v32, %v3110_v9  ;;  %v1613_v9 = vshrl.u32 %v3117_v57, 16  ;;  %v1601_v57 = vsel %vm2585_vm8, %v1597_v34, %v1600_v58  ;;  %v1630_v32 = vshll.u32 %v1516_v21, 16 }
  0xec   :  { %2347 = vmatmul.msk.bf16.gmra.mxu0 %vm592_vm15, %v1413_v25  ;;  %v1621_v25 = vrot.slane %v2847_v45, 6  ;;  %v1713_v56 = vunpack.c.l.b16 %v1601_v57  ;;  %v1714_v58 = vunpack.c.l.b16 %v1611_v11  ;;  %v1831_v45 = vld [vmem:[#allocation2 + $0x3c] sm:$0x8] }
  0xed   :  { %2359 = vmatmul.msk.bf16.gmra.mxu1 %vm592_vm15, %v1725_v33  ;;  %v3165_v15 = vadd.f32 %v3115_v41, %v756_v17  ;;  %v1372_v41 = vsel %vm2986_vm6, %v2334_v55, %v1371_v43  ;;  %v1615_v26 = vrot.slane %v1613_v9, 6  ;;  %v1622_v33 = vrot.slane %v2842_v16, 7  ;;  %v3198_v55 = vld [vmem:[#allocation2 + $0x48] sm:$0xc] }
  0xee   :  { %v1403_v42 = vunpack.c.l.b16 %v1372_v41  ;;  %v1627_v43 = vshrl.u32 %v1516_v21, 16  ;;  %v1932_v17 = vpack.c.b16 %v1921_v38, %v1920_v51  ;;  %v1726_v34 = vpack.c.b16 %v1714_v58, %v1713_v56 }
  0xef   :  { %v3170_v7 = vpop.f32.mrf.mxu0  ;;  %v1619_v16 = vor.u32 %v1618_v35, %v1615_v26  ;;  %v1623_v21 = vor.u32 %v1622_v33, %v1621_v25  ;;  %v2370_v24 = vrot.slane %v1831_v45, 11  ;;  %v1892_v9 = vrot.slane %v1890_v53, 4 }
  0xf0   :  { %v1629_v46 = vrot.slane %v1627_v43, 6  ;;  %v1414_v3 = vpack.c.b16 %v1404_v13, %v1403_v42  ;;  %v2335_v29 = vrot.slane %v3198_v55, 10  ;;  %v1636_v33 = vshrl.u32 %v3154_v52, 16 }
  0xf1   :  { %v1625_v57 = vrot.slane %v1623_v21, 4  ;;  %v1891_v38 = vsel %vm3007_vm10, %v2370_v24, %v1890_v53  ;;  %v1639_v43 = vshll.u32 %v3154_v52, 16  ;;  %v1650_v52 = vshrl.u32 %v3196_v8, 16  ;;  %v1832_v24 = vld [vmem:[#allocation2 + $0x48] sm:$0x8] }
  0xf2   :  { %v757_v23 = vpop.f32.mrf.mxu1  ;;  %v3180_v2 = vpop.f32.mrf.mxu2  ;;  %v1922_v42 = vunpack.c.l.b16 %v1891_v38 }
  0xf3   :  { %v758_v10 = vadd.f32 %v757_v23, %v3127_v12  ;;  %v1378_v12 = vrot.slane %v2923_v5, 6  ;;  %v1620_v23 = vrot.slane %v1619_v16, 4 }
  0xf5   :  { %v3190_v19 = vadd.f32 %v3139_v48, %v758_v10  ;;  %v1632_v48 = vrot.slane %v1630_v32, 7  ;;  %v1380_v41 = vrot.slane %v1378_v12, 4  ;;  %v1379_v44 = vsel %vm2986_vm6, %v2335_v29, %v1378_v12 }
  0xf6   :  { %v1624_v10 = vsel %vm2585_vm8, %v1620_v23, %v1623_v21  ;;  %v1405_v58 = vunpack.c.l.b16 %v1379_v44  ;;  %v1638_v21 = vrot.slane %v1636_v33, 6 }
  0xf7   :  { %v3193_v40 = vpop.f32.mrf.mxu0  ;;  %v1633_v11 = vor.u32 %v1632_v48, %v1629_v46  ;;  %v1382_v35 = vsel %vm2986_vm6, %v1380_v41, %v1381_v20  ;;  %v1715_v53 = vunpack.c.l.b16 %v1624_v10  ;;  %v1641_v46 = vrot.slane %v1639_v43, 7 }
  0xf8   :  { %v1644_v48 = vrot.slane %v2903_v62, 6  ;;  %v1652_v20 = vrot.slane %v1650_v52, 6  ;;  %v1388_v10 = vrot.slane %v2975_v49, 6  ;;  %v1659_v43 = vshrl.u32 %v3198_v55, 16 }
  0xf9   :  { %2383 = vmatmul.msk.bf16.gmra.mxu2 %vm592_vm15, %v1932_v17  ;;  %v1406_v17 = vunpack.c.l.b16 %v1382_v35 }
  0xfa   :  { %v760_v30 = vpop.f32.mrf.mxu1  ;;  %v954_v22 = vpop.f32.mrf.mxu2 }
  0xfb   :  { %v761_v39 = vadd.f32 %v760_v30, %v3151_v37  ;;  %v1894_v37 = vsel %vm3007_vm10, %v1892_v9, %v1893_v54  ;;  %v1518_v30 = vld [vmem:[#allocation2 + $0x50] sm:$0x7]  ;;  %v1415_v9 = vpack.c.b16 %v1406_v17, %v1405_v58 }
  0xfc   :  { %2348 = vmatmul.msk.bf16.gmra.mxu0 %vm592_vm15, %v1414_v3  ;;  %v1923_v25 = vunpack.c.l.b16 %v1894_v37  ;;  %v1645_v3 = vrot.slane %v2900_v61, 7  ;;  %v1642_v61 = vor.u32 %v1641_v46, %v1638_v21  ;;  %v1673_v52 = vshrl.u32 %v1518_v30, 16 }
  0xfd   :  { %2360 = vmatmul.msk.bf16.gmra.mxu1 %vm592_vm15, %v1726_v34  ;;  %v3208_v51 = vadd.f32 %v3158_v6, %v761_v39  ;;  %v1634_v6 = vsel %vm2585_vm8, %v1625_v57, %v1633_v11  ;;  %v1653_v34 = vshll.u32 %v3196_v8, 16  ;;  %v3235_v39 = vld [vmem:[#allocation2 + $0x54] sm:$0xc]  ;;  %v1900_v11 = vrot.slane %v1518_v30, 7 }
  0xfe   :  { %v1716_v12 = vunpack.c.l.b16 %v1634_v6  ;;  %v1933_v16 = vpack.c.b16 %v1923_v25, %v1922_v42  ;;  %v1646_v62 = vor.u32 %v1645_v3, %v1644_v48  ;;  %v2336_v38 = vrot.slane %v3235_v39, 10 }
  0xff   :  { %v3214_v26 = vpop.f32.mrf.mxu0  ;;  %v1655_v23 = vrot.slane %v1653_v34, 7  ;;  %v1643_v6 = vrot.slane %v1642_v61, 4  ;;  %v1667_v3 = vrot.slane %v2934_v63, 6  ;;  %v1676_v34 = vshll.u32 %v1518_v30, 16 }
 0x100   :  { %v1727_v54 = vpack.c.b16 %v1716_v12, %v1715_v53  ;;  %v1648_v42 = vrot.slane %v1646_v62, 4  ;;  %v1904_v61 = vrot.slane %v2971_v50, 7 }
 0x101   :  { %v1656_v25 = vor.u32 %v1655_v23, %v1652_v20  ;;  %v1647_v17 = vsel %vm2585_vm8, %v1643_v6, %v1646_v62  ;;  %v1519_v62 = vld [vmem:[#allocation2 + $0x5c] sm:$0x7]  ;;  %v1669_v23 = vor.u32 %v1668_v0, %v1667_v3 }
 0x102   :  { %v762_v32 = vpop.f32.mrf.mxu1  ;;  %v956_v56 = vpop.f32.mrf.mxu2  ;;  %v1906_v30 = vrot.slane %v1904_v61, 4 }
 0x103   :  { %v763_v13 = vadd.f32 %v762_v32, %v3170_v7  ;;  %v1897_v7 = vrot.slane %v2923_v5, 7  ;;  %v2371_v5 = vrot.slane %v1832_v24, 11  ;;  %v1662_v32 = vshll.u32 %v3198_v55, 16 }
 0x104   :  { %v1657_v53 = vsel %vm2585_vm8, %v1648_v42, %v1656_v25  ;;  %v1661_v55 = vrot.slane %v1659_v43, 6  ;;  %v1671_v6 = vrot.slane %v1669_v23, 4 }
 0x105   :  { %v3228_v45 = vadd.f32 %v3180_v2, %v763_v13  ;;  %v1385_v2 = vrot.slane %v2971_v50, 6  ;;  %v1899_v57 = vrot.slane %v1897_v7, 4  ;;  %v1664_v48 = vrot.slane %v1662_v32, 7 }
 0x107   :  { %v1387_v35 = vrot.slane %v1385_v2, 4  ;;  %v1901_v33 = vsel %vm3007_vm10, %v1899_v57, %v1900_v11  ;;  %v1665_v20 = vor.u32 %v1664_v48, %v1661_v55 }
 0x109   :  { %v3238_v29 = vpop.f32.mrf.mxu0  ;;  %2384 = vmatmul.msk.bf16.gmra.mxu2 %vm592_vm15, %v1933_v16  ;;  %v1389_v13 = vsel %vm2986_vm6, %v1387_v35, %v1388_v10  ;;  %v1925_v16 = vunpack.c.l.b16 %v1901_v33  ;;  %v2449_v35 = vld [vmem:[%s3360_s3 + $0x38] sm:$0xff]  ;;  %v1666_v10 = vrot.slane %v1665_v20, 4 }
 0x10a   :  { %v765_v41 = vpop.f32.mrf.mxu1  ;;  %2119 = vmatpush.bf16.msrb.mxu3 %v2449_v35 }
 0x10b   :  { %v766_v8 = vadd.f32 %v765_v41, %v3193_v40  ;;  %v1898_v40 = vsel %vm3007_vm10, %v2371_v5, %v1897_v7  ;;  %v1678_v5 = vrot.slane %v1676_v34, 7  ;;  %v1670_v32 = vsel %vm2585_vm8, %v1666_v10, %v1669_v23  ;;  %v1251_v34 = vpop.f32.mrf.mxu3  ;;  %v2443_v10 = vld [vmem:[%s3360_s3 + $0x8] sm:$0xff] }
 0x10c   :  { %2349 = vmatmul.msk.bf16.gmra.mxu0 %vm592_vm15, %v1415_v9  ;;  %v959_v44 = vpop.f32.mrf.mxu2  ;;  %v1924_v12 = vunpack.c.l.b16 %v1898_v40  ;;  %v1408_v9 = vunpack.c.l.b16 %v1389_v13 }
 0x10d   :  { %2361 = vmatmul.msk.bf16.gmra.mxu1 %vm592_vm15, %v1727_v54  ;;  %v3245_v37 = vadd.f32 %v954_v22, %v766_v8  ;;  %v1386_v22 = vsel %vm2986_vm6, %v2336_v38, %v1385_v2  ;;  %v1717_v54 = vunpack.c.l.b16 %v1647_v17  ;;  %v1718_v2 = vunpack.c.l.b16 %v1657_v53 }
 0x10e   :  { %v1407_v46 = vunpack.c.l.b16 %v1386_v22  ;;  %v1934_v41 = vpack.c.b16 %v1925_v16, %v1924_v12  ;;  %v1675_v8 = vrot.slane %v1673_v52, 6  ;;  %v1907_v38 = vrot.slane %v1519_v62, 7  ;;  %v2447_v12 = vld [vmem:[%s3360_s3 + $0x28] sm:$0xff] }
 0x10f   :  { %v1728_v57 = vpack.c.b16 %v1718_v2, %v1717_v54  ;;  %v1685_v17 = vshll.u32 %v3235_v39, 16  ;;  %v1696_v54 = vshrl.u32 %v1519_v62, 16  ;;  %v1699_v2 = vshll.u32 %v1519_v62, 16 }
 0x110   :  { %v1416_v63 = vpack.c.b16 %v1408_v9, %v1407_v46  ;;  %v1679_v42 = vor.u32 %v1678_v5, %v1675_v8  ;;  %v1908_v43 = vsel %vm3007_vm10, %v1906_v30, %v1907_v38  ;;  %v1690_v9 = vrot.slane %v2698_v1, 6 }
 0x111   :  { %v653_v49 = vpop.f32.mrf.mxu0  ;;  %v1927_v13 = vunpack.c.l.b16 %v1908_v43  ;;  %v1687_v52 = vrot.slane %v1685_v17, 7  ;;  %v1698_v23 = vrot.slane %v1696_v54, 6  ;;  %v1701_v8 = vrot.slane %v1699_v2, 7 }
 0x112   :  { %v767_v58 = vpop.f32.mrf.mxu1  ;;  %v1680_v22 = vsel %vm2585_vm8, %v1671_v6, %v1679_v42 }
 0x113   :  { %v768_v21 = vadd.f32 %v767_v58, %v3214_v26  ;;  %v1833_v26 = vld [vmem:[#allocation2 + $0x54] sm:$0x8]  ;;  %v1682_v58 = vshrl.u32 %v3235_v39, 16  ;;  %v1720_v46 = vunpack.c.l.b16 %v1680_v22  ;;  %v1691_v39 = vrot.slane %v2696_v60, 7  ;;  %v2445_v60 = vld [vmem:[%s3360_s3 + $0x18] sm:$0xff]  ;;  %v1253_v30 = vpop.f32.mrf.mxu3 }
 0x114   :  { %v961_v24 = vpop.f32.mrf.mxu2 }
 0x115   :  { %v3265_v7 = vadd.f32 %v956_v56, %v768_v21  ;;  %v2372_v56 = vrot.slane %v1833_v26, 11  ;;  %v1719_v21 = vunpack.c.l.b16 %v1670_v32  ;;  %v1684_v0 = vrot.slane %v1682_v58, 6 }
 0x116   :  { %v1692_v20 = vor.u32 %v1691_v39, %v1690_v9  ;;  %v1292_v9 = vadd.f32 %v1253_v30, %v3104_v4 }
 0x117   :  { %v1905_v33 = vsel %vm3007_vm10, %v2372_v56, %v1904_v61  ;;  %v1688_v26 = vor.u32 %v1687_v52, %v1684_v0  ;;  %v2444_v56 = vld [vmem:[%s3360_s3 + $0x10] sm:$0xff] }
 0x119   :  { %v656_v18 = vpop.f32.mrf.mxu0  ;;  %2385 = vmatmul.msk.bf16.gmra.mxu2 %vm592_vm15, %v1934_v41  ;;  %v1729_v41 = vpack.c.b16 %v1720_v46, %v1719_v21 }
 0x11a   :  { %v770_v11 = vpop.f32.mrf.mxu1 }
 0x11b   :  { %v771_v50 = vadd.f32 %v770_v11, %v3238_v29  ;;  %v2448_v29 = vld [vmem:[%s3360_s3 + $0x30] sm:$0xff]  ;;  %v1702_v11 = vor.u32 %v1701_v8, %v1698_v23  ;;  %v1256_v22 = vpop.f32.mrf.mxu3 }
 0x11c   :  { %2350 = vmatmul.msk.bf16.gmra.mxu0 %vm592_vm15, %v1416_v63  ;;  %v964_v40 = vpop.f32.mrf.mxu2  ;;  %2120 = vmatpush.bf16.msrb.mxu3 %v2448_v29  ;;  %v1689_v63 = vrot.slane %v1688_v26, 4  ;;  %v2442_v29 = vld [vmem:[%s3360_s3] sm:$0xff] }
 0x11d   :  { %2362 = vmatmul.msk.bf16.gmra.mxu1 %vm592_vm15, %v1728_v57  ;;  %v3275_v25 = vadd.f32 %v959_v44, %v771_v50  ;;  %v1926_v44 = vunpack.c.l.b16 %v1905_v33  ;;  %v1694_v57 = vrot.slane %v1692_v20, 4 }
 0x11f   :  { %v1935_v3 = vpack.c.b16 %v1927_v13, %v1926_v44  ;;  %v1703_v50 = vsel %vm2585_vm8, %v1694_v57, %v1702_v11 }
 0x120   :  { %2121 = vmatpush.bf16.msrb.mxu3 %v2447_v12  ;;  %v1722_v43 = vunpack.c.l.b16 %v1703_v50 }
 0x121   :  { %v658_v53 = vpop.f32.mrf.mxu0 }
 0x122   :  { %v772_v31 = vpop.f32.mrf.mxu1 }
 0x123   :  { %v773_v16 = vadd.f32 %v772_v31, %v653_v49  ;;  %v2446_v49 = vld [vmem:[%s3360_s3 + $0x20] sm:$0xff]  ;;  %v1258_v12 = vpop.f32.mrf.mxu3 }
 0x124   :  { %v966_v48 = vpop.f32.mrf.mxu2  ;;  %2122 = vmatpush.bf16.msrb.mxu3 %v2446_v49  ;;  %v1294_v4 = vadd.f32 %v1258_v12, %v3147_v27 }
 0x125   :  { %v3293_v55 = vadd.f32 %v961_v24, %v773_v16 }
 0x128   :  { %2123 = vmatpush.bf16.msrb.mxu3 %v2445_v60 }
 0x129   :  { %v1456_v24 = vpop.f32.mrf.mxu0  ;;  %2386 = vmatmul.msk.bf16.gmra.mxu2 %vm592_vm15, %v1935_v3  ;;  %v1291_v3 = vadd.f32 %v1251_v34, %v3082_v59  ;;  %v1293_v59 = vadd.f32 %v1256_v22, %v3123_v36 }
 0x12a   :  { %v775_v61 = vpop.f32.mrf.mxu1 }
 0x12b   :  { %v776_v1 = vadd.f32 %v775_v61, %v656_v18  ;;  %v1693_v18 = vsel %vm2585_vm8, %v1689_v63, %v1692_v20  ;;  %v1496_v0 = vadd.f32 %v1456_v24, %v1291_v3  ;;  %vm2211_vm8 = vcmask 261120  }
 0x12c   :  { %v969_v5 = vpop.f32.mrf.mxu2  ;;  %2124 = vmatpush.bf16.msrb.mxu3 %v2444_v56  ;;  %v1721_v33 = vunpack.c.l.b16 %v1693_v18 }
 0x12d   :  { %2363 = vmatmul.msk.bf16.gmra.mxu1 %vm592_vm15, %v1729_v41  ;;  %v3305_v62 = vadd.f32 %v964_v40, %v776_v1 }
 0x12e   :  { %v1730_v32 = vpack.c.b16 %v1722_v43, %v1721_v33 }
 0x130   :  { %2125 = vmatpush.bf16.msrb.mxu3 %v2443_v10 }
 0x131   :  { %v1458_v35 = vpop.f32.mrf.mxu0 }
 0x132   :  { %v777_v38 = vpop.f32.mrf.mxu1  ;;  %v1497_v2 = vadd.f32 %v1458_v35, %v1292_v9 }
 0x133   :  { %v778_v6 = vadd.f32 %v777_v38, %v658_v53 }
 0x134   :  { %v971_v40 = vpop.f32.mrf.mxu2  ;;  %2126 = vmatpush.bf16.msrb.mxu3 %v2442_v29 }
 0x135   :  { %v3317_v42 = vadd.f32 %v966_v48, %v778_v6 }
 0x139   :  { %v1461_v13 = vpop.f32.mrf.mxu0 }
 0x13a   :  { %v780_v28 = vpop.f32.mrf.mxu1  ;;  %v1498_v34 = vadd.f32 %v1461_v13, %v1293_v59 }
 0x13b   :  { %v781_v44 = vadd.f32 %v780_v28, %v3035_v47  ;;  %v1261_v47 = vpop.f32.mrf.mxu3 }
 0x13c   :  { %v1975_v17 = vpop.f32.mrf.mxu2  ;;  %v1295_v36 = vadd.f32 %v1261_v47, %v3165_v15 }
 0x13d   :  { %2364 = vmatmul.msk.bf16.gmra.mxu1 %vm592_vm15, %v1730_v32  ;;  %v3324_v58 = vadd.f32 %v969_v5, %v781_v44 }
 0x141   :  { %v1463_v46 = vpop.f32.mrf.mxu0 }
 0x142   :  { %v782_v53 = vpop.f32.mrf.mxu1  ;;  %v1499_v57 = vadd.f32 %v1463_v46, %v1294_v4 }
 0x143   :  { %v783_v31 = vadd.f32 %v782_v53, %v3056_v14  ;;  %v1263_v8 = vpop.f32.mrf.mxu3 }
 0x144   :  { %v1977_v21 = vpop.f32.mrf.mxu2  ;;  %v1296_v22 = vadd.f32 %v1263_v8, %v3190_v19 }
 0x145   :  { %v3327_v16 = vadd.f32 %v971_v40, %v783_v31 }
 0x149   :  { %v1466_v54 = vpop.f32.mrf.mxu0 }
 0x14a   :  { %v1770_v48 = vpop.f32.mrf.mxu1  ;;  %v1500_v29 = vadd.f32 %v1466_v54, %v1295_v36 }
 0x14b   :  { %v1810_v39 = vadd.f32 %v1770_v48, %v1496_v0  ;;  %v1266_v11 = vpop.f32.mrf.mxu3 }
 0x14c   :  { %v1980_v52 = vpop.f32.mrf.mxu2 }
 0x14d   :  { %v2015_v41 = vadd.f32 %v1975_v17, %v1810_v39 }
 0x14f   :  { %v2031_v20 = vand.u32 2147483647, %v2015_v41 }
 0x151   :  { %v1468_v1 = vpop.f32.mrf.mxu0 }
 0x152   :  { %v1772_v49 = vpop.f32.mrf.mxu1  ;;  %v1501_v44 = vadd.f32 %v1468_v1, %v1296_v22 }
 0x153   :  { %v1811_v61 = vadd.f32 %v1772_v49, %v1497_v2  ;;  %v1268_v43 = vpop.f32.mrf.mxu3 }
 0x154   :  { %v1982_v26 = vpop.f32.mrf.mxu2  ;;  %v1298_v19 = vadd.f32 %v1268_v43, %v3228_v45 }
 0x155   :  { %v2016_v14 = vadd.f32 %v1977_v21, %v1811_v61 }
 0x157   :  { %v2032_v23 = vand.u32 2147483647, %v2016_v14 }
 0x159   :  { %v2047_v60 = vpack.c.bf16 %v2032_v23, %v2031_v20  ;;  %v1471_v35 = vpop.f32.mrf.mxu0 }
 0x15a   :  { %v1775_v5 = vpop.f32.mrf.mxu1 }
 0x15b   :  { %2127 = vmatmul.bf16.vlgmr.msrb.gmra.mxu3 %v2047_v60  ;;  %v1812_v63 = vadd.f32 %v1775_v5, %v1498_v34  ;;  %v1271_v21 = vpop.f32.mrf.mxu3 }
 0x15c   :  { %v1985_v24 = vpop.f32.mrf.mxu2 }
 0x15d   :  { %v2017_v30 = vadd.f32 %v1980_v52, %v1812_v63  ;;  %v1297_v52 = vadd.f32 %v1266_v11, %v3208_v51  ;;  %v1299_v51 = vadd.f32 %v1271_v21, %v3245_v37 }
 0x15f   :  { %v2033_v10 = vand.u32 2147483647, %v2017_v30  ;;  %v1502_v47 = vadd.f32 %v1471_v35, %v1297_v52 }
 0x161   :  { %v1473_v27 = vpop.f32.mrf.mxu0 }
 0x162   :  { %v1777_v56 = vpop.f32.mrf.mxu1  ;;  %v1503_v2 = vadd.f32 %v1473_v27, %v1298_v19 }
 0x163   :  { %v1813_v38 = vadd.f32 %v1777_v56, %v1499_v57  ;;  %v1273_v54 = vpop.f32.mrf.mxu3 }
 0x164   :  { %v1987_v50 = vpop.f32.mrf.mxu2  ;;  %v1300_v45 = vadd.f32 %v1273_v54, %v3265_v7 }
 0x165   :  { %v2018_v18 = vadd.f32 %v1982_v26, %v1813_v38 }
 0x167   :  { %v2034_v6 = vand.u32 2147483647, %v2018_v18 }
 0x169   :  { %v2048_v40 = vpack.c.bf16 %v2034_v6, %v2033_v10  ;;  %v1476_v3 = vpop.f32.mrf.mxu0 }
 0x16a   :  { %v1780_v33 = vpop.f32.mrf.mxu1  ;;  %v1504_v34 = vadd.f32 %v1476_v3, %v1299_v51 }
 0x16b   :  { %2132 = vmatmul.bf16.gmra.mxu3 %v2048_v40  ;;  %v1814_v28 = vadd.f32 %v1780_v33, %v1500_v29  ;;  %v1276_v1 = vpop.f32.mrf.mxu3 }
 0x16c   :  { %v1990_v32 = vpop.f32.mrf.mxu2  ;;  %v1301_v37 = vadd.f32 %v1276_v1, %v3275_v25 }
 0x16d   :  { %v2019_v17 = vadd.f32 %v1985_v24, %v1814_v28 }
 0x16f   :  { %v2035_v46 = vand.u32 2147483647, %v2019_v17 }
 0x171   :  { %v1478_v49 = vpop.f32.mrf.mxu0 }
 0x172   :  { %v1782_v13 = vpop.f32.mrf.mxu1  ;;  %v1505_v4 = vadd.f32 %v1478_v49, %v1300_v45 }
 0x173   :  { %v1815_v53 = vadd.f32 %v1782_v13, %v1501_v44  ;;  %v1278_v30 = vpop.f32.mrf.mxu3 }
 0x174   :  { %v1992_v12 = vpop.f32.mrf.mxu2  ;;  %v1302_v7 = vadd.f32 %v1278_v30, %v3293_v55 }
 0x175   :  { %v2020_v31 = vadd.f32 %v1987_v50, %v1815_v53 }
 0x177   :  { %v2036_v48 = vand.u32 2147483647, %v2020_v31 }
 0x179   :  { %v2049_v0 = vpack.c.bf16 %v2036_v48, %v2035_v46  ;;  %v1481_v59 = vpop.f32.mrf.mxu0 }
 0x17a   :  { %v1785_v15 = vpop.f32.mrf.mxu1  ;;  %v1506_v33 = vadd.f32 %v1481_v59, %v1301_v37 }
 0x17b   :  { %2137 = vmatmul.bf16.gmra.mxu3 %v2049_v0  ;;  %v1816_v39 = vadd.f32 %v1785_v15, %v1502_v47  ;;  %v1281_v36 = vpop.f32.mrf.mxu3 }
 0x17c   :  { %v1995_v9 = vpop.f32.mrf.mxu2  ;;  %v1303_v46 = vadd.f32 %v1281_v36, %v3305_v62 }
 0x17d   :  { %v2021_v61 = vadd.f32 %v1990_v32, %v1816_v39 }
 0x17f   :  { %v2037_v20 = vand.u32 2147483647, %v2021_v61 }
 0x181   :  { %v1483_v35 = vpop.f32.mrf.mxu0 }
 0x182   :  { %v1787_v41 = vpop.f32.mrf.mxu1  ;;  %v1507_v32 = vadd.f32 %v1483_v35, %v1302_v7 }
 0x183   :  { %v1817_v14 = vadd.f32 %v1787_v41, %v1503_v2  ;;  %v1283_v31 = vpop.f32.mrf.mxu3 }
 0x184   :  { %v1997_v8 = vpop.f32.mrf.mxu2  ;;  %v1304_v55 = vadd.f32 %v1283_v31, %v3317_v42 }
 0x185   :  { %v2022_v26 = vadd.f32 %v1992_v12, %v1817_v14 }
 0x187   :  { %v2038_v23 = vand.u32 2147483647, %v2022_v26 }
 0x189   :  { %v2050_v60 = vpack.c.bf16 %v2038_v23, %v2037_v20  ;;  %v1486_v29 = vpop.f32.mrf.mxu0 }
 0x18a   :  { %v1790_v5 = vpop.f32.mrf.mxu1  ;;  %v1508_v48 = vadd.f32 %v1486_v29, %v1303_v46 }
 0x18b   :  { %2142 = vmatmul.bf16.gmra.mxu3 %v2050_v60  ;;  %v1818_v24 = vadd.f32 %v1790_v5, %v1504_v34  ;;  %v1286_v52 = vpop.f32.mrf.mxu3 }
 0x18c   :  { %v2000_v57 = vpop.f32.mrf.mxu2  ;;  %v1305_v62 = vadd.f32 %v1286_v52, %v3324_v58 }
 0x18d   :  { %v2023_v11 = vadd.f32 %v1995_v9, %v1818_v24 }
 0x18f   :  { %v2039_v18 = vand.u32 2147483647, %v2023_v11 }
 0x191   :  { %v1488_v21 = vpop.f32.mrf.mxu0 }
 0x192   :  { %v1792_v63 = vpop.f32.mrf.mxu1  ;;  %v1509_v15 = vadd.f32 %v1488_v21, %v1304_v55 }
 0x193   :  { %v1819_v56 = vadd.f32 %v1792_v63, %v1505_v4  ;;  %v1288_v26 = vpop.f32.mrf.mxu3 }
 0x194   :  { %v2002_v40 = vpop.f32.mrf.mxu2  ;;  %v1306_v23 = vadd.f32 %v1288_v26, %v3327_v16 }
 0x195   :  { %v2024_v38 = vadd.f32 %v1997_v8, %v1819_v56 }
 0x197   :  { %v2040_v50 = vand.u32 2147483647, %v2024_v38 }
 0x199   :  { %v2051_v10 = vpack.c.bf16 %v2040_v50, %v2039_v18  ;;  %v1491_v39 = vpop.f32.mrf.mxu0 }
 0x19a   :  { %v1795_v6 = vpop.f32.mrf.mxu1  ;;  %v1510_v20 = vadd.f32 %v1491_v39, %v1305_v62 }
 0x19b   :  { %2147 = vmatmul.bf16.gmra.mxu3 %v2051_v10  ;;  %v1820_v43 = vadd.f32 %v1795_v6, %v1506_v33 }
 0x19c   :  { %v2005_v13 = vpop.f32.mrf.mxu2 }
 0x19d   :  { %v2025_v22 = vadd.f32 %v2000_v57, %v1820_v43 }
 0x19f   :  { %v2041_v17 = vand.u32 2147483647, %v2025_v22 }
 0x1a1   :  { %v1493_v42 = vpop.f32.mrf.mxu0 }
 0x1a2   :  { %v1797_v27 = vpop.f32.mrf.mxu1  ;;  %v1511_v60 = vadd.f32 %v1493_v42, %v1306_v23 }
 0x1a3   :  { %v1821_v28 = vadd.f32 %v1797_v27, %v1507_v32 }
 0x1a4   :  { %v2007_v0 = vpop.f32.mrf.mxu2 }
 0x1a5   :  { %v2026_v44 = vadd.f32 %v2002_v40, %v1821_v28 }
 0x1a7   :  { %v2042_v53 = vand.u32 2147483647, %v2026_v44  ;;  %v2450_v44 = vld [vmem:[%s3359_s2] sm:$0xff] }
 0x1a9   :  { %v2052_v12 = vpack.c.bf16 %v2042_v53, %v2041_v17 }
 0x1aa   :  { %v1800_v25 = vpop.f32.mrf.mxu1 }
 0x1ab   :  { %2152 = vmatmul.bf16.gmra.mxu3 %v2052_v12  ;;  %v1822_v3 = vadd.f32 %v1800_v25, %v1508_v48 }
 0x1ac   :  { %v2010_v61 = vpop.f32.mrf.mxu2 }
 0x1ad   :  { %v2027_v9 = vadd.f32 %v2005_v13, %v1822_v3  ;;  %v2451_v13 = vld [vmem:[%s3359_s2 + $0x8] sm:$0xff] }
 0x1af   :  { %v2043_v2 = vand.u32 2147483647, %v2027_v9 }
 0x1b2   :  { %v1802_v47 = vpop.f32.mrf.mxu1 }
 0x1b3   :  { %v1823_v19 = vadd.f32 %v1802_v47, %v1509_v15 }
 0x1b4   :  { %v2012_v59 = vpop.f32.mrf.mxu2 }
 0x1b5   :  { %v2028_v54 = vadd.f32 %v2007_v0, %v1823_v19 }
 0x1b7   :  { %v2044_v49 = vand.u32 2147483647, %v2028_v54 }
 0x1b9   :  { %v2053_v41 = vpack.c.bf16 %v2044_v49, %v2043_v2 }
 0x1ba   :  { %v1805_v14 = vpop.f32.mrf.mxu1 }
 0x1bb   :  { %2157 = vmatmul.bf16.gmra.mxu3 %v2053_v41  ;;  %v1824_v8 = vadd.f32 %v1805_v14, %v1510_v20 }
 0x1bd   :  { %v2029_v5 = vadd.f32 %v2010_v61, %v1824_v8 }
 0x1bf   :  { %v2045_v45 = vand.u32 2147483647, %v2029_v5 }
 0x1c2   :  { %v1807_v1 = vpop.f32.mrf.mxu1 }
 0x1c3   :  { %v1825_v51 = vadd.f32 %v1807_v1, %v1511_v60 }
 0x1c5   :  { %v2030_v34 = vadd.f32 %v2012_v59, %v1825_v51 }
 0x1c7   :  { %v2046_v24 = vand.u32 2147483647, %v2030_v34 }
 0x1c9   :  { %v2054_v4 = vpack.c.bf16 %v2046_v24, %v2045_v45 }
 0x1cb   :  { %2162 = vmatmul.bf16.gmra.mxu3 %v2054_v4 }
 0x1de   :  { %v2128_v63 = vpop.f32.mrf.mxu3 }
 0x1e6   :  { %v2130_v57 = vpop.f32.mrf.mxu3 }
 0x1e7   :  { %v2172_v58 = vpack.c.bf16 %v2130_v57, %v2128_v63 }
 0x1ee   :  { %v2133_v11 = vpop.f32.mrf.mxu3 }
 0x1f6   :  { %v2135_v56 = vpop.f32.mrf.mxu3 }
 0x1f7   :  { %v2173_v30 = vpack.c.bf16 %v2135_v56, %v2133_v11 }
 0x1fe   :  { %v2138_v38 = vpop.f32.mrf.mxu3 }
 0x206   :  { %v2140_v35 = vpop.f32.mrf.mxu3 }
 0x207   :  { %v2174_v16 = vpack.c.bf16 %v2140_v35, %v2138_v38 }
 0x20e   :  { %v2143_v18 = vpop.f32.mrf.mxu3 }
 0x216   :  { %v2145_v50 = vpop.f32.mrf.mxu3 }
 0x217   :  { %v2175_v10 = vpack.c.bf16 %v2145_v50, %v2143_v18 }
 0x21e   :  { %v2148_v6 = vpop.f32.mrf.mxu3 }
 0x226   :  { %v2150_v37 = vpop.f32.mrf.mxu3 }
 0x227   :  { %v2176_v28 = vpack.c.bf16 %v2150_v37, %v2148_v6 }
 0x22e   :  { %v2153_v40 = vpop.f32.mrf.mxu3 }
 0x236   :  { %v2155_v33 = vpop.f32.mrf.mxu3 }
 0x237   :  { %v2177_v22 = vpack.c.bf16 %v2155_v33, %v2153_v40 }
 0x23e   :  { %v2158_v36 = vpop.f32.mrf.mxu3 }
 0x246   :  { %v2160_v7 = vpop.f32.mrf.mxu3 }
 0x247   :  { %v2178_v27 = vpack.c.bf16 %v2160_v7, %v2158_v36 }
 0x24e   :  { %v2163_v43 = vpop.f32.mrf.mxu3 }
 0x256   :  { %v2165_v29 = vpop.f32.mrf.mxu3 }
 0x257   :  { %v2179_v32 = vpack.c.bf16 %v2165_v29, %v2163_v43 }
 0x259   :  { %2192 = vmatpush.bf16.msra.mxu0 %v2179_v32 }
 0x25d   :  { %2193 = vmatpush.bf16.msra.mxu0 %v2178_v27 }
 0x261   :  { %2194 = vmatpush.bf16.msra.mxu0 %v2177_v22 }
 0x265   :  { %2195 = vmatpush.bf16.msra.mxu0 %v2176_v28 }
 0x269   :  { %2196 = vmatpush.bf16.msra.mxu0 %v2175_v10 }
 0x26d   :  { %2197 = vmatpush.bf16.msra.mxu0 %v2174_v16 }
 0x271   :  { %2198 = vmatpush.bf16.msra.mxu0 %v2173_v30 }
 0x275   :  { %2199 = vmatpush.bf16.msra.mxu0 %v2172_v58 }
 0x278   :  { %2200 = vmatmul.bf16.vlgmr.msra.gmra.mxu0 %v2450_v44 }
 0x288   :  { %2205 = vmatmul.bf16.gmra.mxu0 %v2451_v13 }
 0x2f5   :  { %v2201_v17 = vpop.f32.mrf.mxu0 }
 0x2f6   :  { %2212 = vst.msk [vmem:[#allocation6] sm:$0xff] %vm2211_vm8, %v2201_v17 }
 0x2fd   :  { %v2203_v53 = vpop.f32.mrf.mxu0 }
 0x2fe   :  { %2213 = vst.msk [vmem:[#allocation6 + $0x8] sm:$0xff] %vm2211_vm8, %v2203_v53 }
 0x305   :  { %v2206_v31 = vpop.f32.mrf.mxu0 }
 0x306   :  { %2214 = vst.msk [vmem:[#allocation6 + $0x10] sm:$0xff] %vm2211_vm8, %v2206_v31 }
 0x30d   :  { %v2208_v12 = vpop.f32.mrf.mxu0 }
 0x30e   :  { %2215 = vst.msk [vmem:[#allocation6 + $0x18] sm:$0xff] %vm2211_vm8, %v2208_v12 }
 0x30f   :  { %2228 = dma.vmem_to_hbm [thread:$0]  %s2221_s29, 512, %s2223_s6, [#allocation5], %s2515_s20, %s2515_s20, %s2516_s21  }
 0x310   :  { %2512 = dma.done.wait [#allocation5], 512  }
 0x311   :  { %2513 = vsyncadd [#allocation5], 4294966784 }
 0x312   :  { %2233 = vsyncpa [#allocation4], 1 }
 0x313   :  { %2234 = vsyncpa [#allocation5], 1 }

</bundles_post_ra>
